<compile_context>
chip_gen: v7x
topology: tpu7x:2x2x1
jax: 0.10.0
libtpu: 0.0.40
codegen_flags: <defaults>
</compile_context>

<pallas_src>
import math

import jax
import jax.numpy as jnp
from jax import lax
from jax.experimental import pallas as pl
from jax.experimental.pallas import tpu as pltpu

IN_FEATURES = 256     # fixed by the module's hard-coded x.view(-1, 256)
NUM_NODES = 10        # fixed by the module's hard-coded support.view(-1, 10, .)
LANES = 128
CHUNK_GRAPHS = 8      # graphs per register-tiled chunk (80 rows; 80 % 16 == 0)


def _round_up(v, m):
    return (v + m - 1) // m * m


def _vmem_capacity_bytes():
    try:
        info = pltpu.get_tpu_info()
        cap = getattr(info, "vmem_capacity_bytes", None)
        if cap:
            return int(cap)
    except Exception:
        pass
    return 128 * 1024 * 1024


def _gcn_kernel(x_ref, adj_ref, w_ref, b_ref, o_ref, sup_ref):
    # x_ref:   (TB*10, 256)  node rows, batch-major (row b*10+j = graph b, node j)
    # adj_ref: (TB, 100)     flattened adjacency, row b = adj[b].reshape(100), f32
    # w_ref:   (256, Fp)     resident across the grid (constant index map)
    # b_ref:   (1, Fp)       resident
    # o_ref:   (TB*10, Fp)   2-D lane/sublane-dense output block
    # sup_ref: (TB*10, Fp)   f32 VMEM scratch for support = x @ W
    fp = o_ref.shape[1]
    tb = adj_ref.shape[0]
    rows = CHUNK_GRAPHS * NUM_NODES                      # 80

    # ---- phase 1: support = x @ W ------------------------------------------
    # One large MXU matmul (full M occupancy), f32 accumulation, written
    # exactly once to the 2-D scratch.
    sup_ref[...] = jnp.dot(x_ref[...], w_ref[...],
                           preferred_element_type=jnp.float32)

    # ---- phase 2: out = adj @ support + bias on the VPU ---------------------
    # Register-tiled over chunks of CHUNK_GRAPHS graphs so the accumulator and
    # the support chunk stay in vregs; each output chunk is stored once.
    bias = jnp.broadcast_to(
        b_ref[...].astype(jnp.float32).reshape(1, 1, fp),
        (CHUNK_GRAPHS, NUM_NODES, fp))                   # hoisted out of the loop

    def chunk_body(c, carry):
        r0 = pl.multiple_of(c * rows, 16)                # 80*c: f32/bf16 tile aligned
        g0 = pl.multiple_of(c * CHUNK_GRAPHS, CHUNK_GRAPHS)
        sup = sup_ref[pl.ds(r0, rows), :].reshape(CHUNK_GRAPHS, NUM_NODES, fp)
        adj = adj_ref[pl.ds(g0, CHUNK_GRAPHS), :].astype(jnp.float32)
        adj = adj.reshape(CHUNK_GRAPHS, NUM_NODES, NUM_NODES)
        acc = bias                                       # bias folded into init
        for j in range(NUM_NODES):                       # unrolled, N = 10
            acc = acc + adj[:, :, j:j + 1] * sup[:, j:j + 1, :]
        o_ref[pl.ds(r0, rows), :] = acc.reshape(rows, fp).astype(o_ref.dtype)
        return carry

    lax.fori_loop(0, tb // CHUNK_GRAPHS, chunk_body, 0, unroll=False)


def graph_convolution(x, adj, weight, bias=None, *, block_b=None,
                      compute_dtype=jnp.bfloat16, out_dtype=None):
    """GCN layer forward (matches GraphConvolution.forward).

    x:      (..., 256) with prod(leading) == B*10; pass it pre-flattened as
            (B*10, 256) (the layout the PyTorch module views anyway) to avoid
            an XLA relayout copy.
    adj:    (B, 100) flattened adjacency (preferred) or (B, 10, 10).
    weight: (256, F_out); bias: (F_out,) or None.
    block_b: graphs per grid step; default derived from VMEM capacity.
    compute_dtype: dtype for x/W on the MXU (f32 accumulation either way);
            bf16 (default) halves the dominant HBM read. Use jnp.float32 for
            exact float32 numerics. Adjacency stays f32 in both cases.
    out_dtype: output dtype (default: x.dtype).
    """
    x2 = x.reshape(-1, IN_FEATURES)
    M = x2.shape[0]
    assert M % NUM_NODES == 0, "leading dims of x must be a multiple of 10 nodes"
    B = M // NUM_NODES

    if adj.ndim == 3:
        assert adj.shape == (B, NUM_NODES, NUM_NODES)
        adj2 = adj.reshape(B, NUM_NODES * NUM_NODES)   # prefer pre-flattened input
    else:
        assert adj.shape == (B, NUM_NODES * NUM_NODES)
        adj2 = adj
    if adj2.dtype != jnp.float32:
        adj2 = adj2.astype(jnp.float32)

    assert weight.shape[0] == IN_FEATURES
    F_out = weight.shape[1]
    if out_dtype is None:
        out_dtype = x.dtype
    cdt = jnp.dtype(compute_dtype) if compute_dtype is not None else jnp.dtype(x.dtype)

    # --- pad the feature axis to a lane-dense width (multiple of 128) -------
    Fp = _round_up(max(F_out, 1), LANES)
    if Fp != F_out:
        weight = jnp.pad(weight, ((0, 0), (0, Fp - F_out)))
    if bias is None:
        bias2 = jnp.zeros((1, Fp), jnp.float32)
    else:
        bias2 = jnp.pad(bias.astype(jnp.float32), (0, Fp - F_out)).reshape(1, Fp)

    # --- per-generation VMEM budget and batch tile ---------------------------
    vmem_cap = _vmem_capacity_bytes()
    vmem_limit = min(int(vmem_cap) * 3 // 4, 100 * 1024 * 1024)   # ~48 MiB v7x, ~96 MiB v5e/v6e
    if block_b is None:
        block_b = 256 if vmem_cap <= 64 * 1024 * 1024 else 768

    x_isz = cdt.itemsize
    o_isz = jnp.dtype(out_dtype).itemsize
    # double-buffered x/adj/out blocks + f32 support scratch + resident W/bias
    per_graph = (NUM_NODES * IN_FEATURES * x_isz) * 2 \
              + (NUM_NODES * Fp * o_isz) * 2 \
              + (NUM_NODES * Fp * 4) + LANES * 4 * 2
    fixed = IN_FEATURES * Fp * x_isz * 2 + Fp * 4 * 2
    fit = max(CHUNK_GRAPHS, (int(vmem_limit * 0.8) - fixed) // per_graph)

    g = CHUNK_GRAPHS
    tb = max(g, min(block_b, fit, _round_up(B, g)) // g * g)
    # >= 2 grid steps when the batch allows it: shards the "parallel" axis
    # across both v7x TensorCores and enables DMA/compute overlap everywhere.
    half = _round_up(max((B + 1) // 2, g), g)
    if half < B:
        tb = min(tb, half)

    Bp = _round_up(B, tb)
    if Bp != B:
        x2 = jnp.pad(x2, ((0, (Bp - B) * NUM_NODES), (0, 0)))
        adj2 = jnp.pad(adj2, ((0, Bp - B), (0, 0)))

    if x2.dtype != cdt:
        x2 = x2.astype(cdt)
    if weight.dtype != cdt:
        weight = weight.astype(cdt)

    grid = (Bp // tb,)
    out2 = pl.pallas_call(
        _gcn_kernel,
        out_shape=jax.ShapeDtypeStruct((Bp * NUM_NODES, Fp), out_dtype),
        grid_spec=pltpu.PrefetchScalarGridSpec(
            num_scalar_prefetch=0,
            grid=grid,
            in_specs=[
                pl.BlockSpec((tb * NUM_NODES, IN_FEATURES), lambda b: (b, 0)),  # x rows
                pl.BlockSpec((tb, NUM_NODES * NUM_NODES), lambda b: (b, 0)),    # adj (flat)
                pl.BlockSpec((IN_FEATURES, Fp), lambda b: (0, 0)),              # W (resident)
                pl.BlockSpec((1, Fp), lambda b: (0, 0)),                        # bias
            ],
            out_specs=pl.BlockSpec((tb * NUM_NODES, Fp), lambda b: (b, 0)),
            scratch_shapes=[pltpu.VMEM((tb * NUM_NODES, Fp), jnp.float32)],     # support
        ),
        compiler_params=pltpu.CompilerParams(
            dimension_semantics=("parallel",),
            vmem_limit_bytes=vmem_limit,
        ),
    )(x2, adj2, weight, bias2)

    # 2-D kernel output; the reshape + slice fuse with downstream consumers.
    return out2.reshape(Bp, NUM_NODES, Fp)[:B, :, :F_out]


def reference(x, adj, weight, bias):
    x2 = x.reshape(-1, IN_FEATURES)
    support = x2 @ weight
    support = support.reshape(-1, NUM_NODES, weight.shape[1])
    out = jnp.einsum("bij,bjf->bif", adj, support)
    return out + bias


if __name__ == "__main__":
    key = jax.random.PRNGKey(0)
    k_x, k_adj, k_w, k_b = jax.random.split(key, 4)

    B = 12                 # deliberately not a multiple of 8: exercises padding
    out_features = 32      # padded to 128 lanes inside the kernel

    # Deterministic parameter init mimicking reset_parameters():
    # uniform(-stdv, stdv), stdv = 1 / sqrt(out_features)
    stdv = 1.0 / math.sqrt(out_features)
    weight = jax.random.uniform(k_w, (IN_FEATURES, out_features),
                                minval=-stdv, maxval=stdv, dtype=jnp.float32)
    bias = jax.random.uniform(k_b, (out_features,),
                              minval=-stdv, maxval=stdv, dtype=jnp.float32)

    # x pre-flattened to (B*10, 256) (the view the module uses) and adj
    # pre-flattened to (B, 100) (the preferred, compact HBM layout).
    x = jax.random.normal(k_x, (B * NUM_NODES, IN_FEATURES), dtype=jnp.float32)
    adj_flat = jax.random.uniform(k_adj, (B, NUM_NODES * NUM_NODES),
                                  dtype=jnp.float32)
    adj3d = adj_flat.reshape(B, NUM_NODES, NUM_NODES)

    ref = reference(x, adj3d, weight, bias)

    # Exact-f32 path (matches the PyTorch module's numerics). Default sizing
    # already gives a 2-step grid here (B=12 -> tb=8, Bp=16), so tiling,
    # batch padding and the chunked accumulator are all exercised.
    out_f32 = jax.block_until_ready(
        graph_convolution(x, adj_flat, weight, bias, compute_dtype=jnp.float32))
    assert out_f32.shape == (B, NUM_NODES, out_features)
    assert jnp.allclose(out_f32, ref, atol=1e-3, rtol=1e-3)

    # Default path: bf16 x/W on the MXU with f32 accumulation, f32 output.
    out_bf16 = jax.block_until_ready(graph_convolution(x, adj_flat, weight, bias))
    assert out_bf16.shape == (B, NUM_NODES, out_features)
    assert jnp.allclose(out_bf16, ref, atol=2e-1, rtol=5e-2)

    # 3-D x / 3-D adj inputs (accepted but less efficient) with an explicit tile.
    out_3d = jax.block_until_ready(
        graph_convolution(x.reshape(B, NUM_NODES, IN_FEATURES), adj3d,
                          weight, bias, block_b=8, compute_dtype=jnp.float32))
    assert jnp.allclose(out_3d, ref, atol=1e-3, rtol=1e-3)

    print("KERNEL_OK")
</pallas_src>

<mosaic_0001>
module attributes {stable_mosaic.version = 11 : i64} {
  func.func @_gcn_kernel(%arg0: i32, %arg1: memref<80x256xf32, #tpu.memory_space<vmem>>, %arg2: memref<8x100xf32, #tpu.memory_space<vmem>>, %arg3: memref<256x128xf32, #tpu.memory_space<vmem>>, %arg4: memref<1x128xf32, #tpu.memory_space<vmem>>, %arg5: memref<80x128xf32, #tpu.memory_space<vmem>>, %arg6: memref<80x128xf32, #tpu.memory_space<vmem>>) attributes {dimension_semantics = [#tpu.dimension_semantics<parallel>], iteration_bounds = array<i64: 2>, scalar_prefetch = 0 : i64, scratch_operands = 1 : i64, tpu.core_type = #tpu.core_type<tc>, window_params = [{transform_indices = @transform_0, window_bounds = array<i64: 80, 256>}, {transform_indices = @transform_1, window_bounds = array<i64: 8, 100>}, {pipeline_mode = #tpu.pipeline_mode<synchronous>, transform_indices = @transform_2, window_bounds = array<i64: 256, 128>}, {pipeline_mode = #tpu.pipeline_mode<synchronous>, transform_indices = @transform_3, window_bounds = array<i64: 1, 128>}, {transform_indices = @transform_4, window_bounds = array<i64: 80, 128>}]} {
    %c0 = arith.constant 0 : index
    %c0_0 = arith.constant 0 : index
    %0 = vector.load %arg1[%c0, %c0_0] : memref<80x256xf32, #tpu.memory_space<vmem>>, vector<80x256xf32>
    %c0_1 = arith.constant 0 : index
    %c0_2 = arith.constant 0 : index
    %1 = vector.load %arg3[%c0_1, %c0_2] : memref<256x128xf32, #tpu.memory_space<vmem>>, vector<256x128xf32>
    %cst = arith.constant dense<0.000000e+00> : vector<80x128xf32>
    %2 = tpu.matmul %0, %1, %cst {dimension_numbers = #tpu.dot_dimension_numbers<[1], [0], [0], [1], [0, 0, 1, 1], [], []>} : vector<80x256xf32>, vector<256x128xf32>, vector<80x128xf32> -> vector<80x128xf32>
    %c0_3 = arith.constant 0 : index
    %c0_4 = arith.constant 0 : index
    %3 = vector.load %arg6[%c0_3, %c0_4] : memref<80x128xf32, #tpu.memory_space<vmem>>, vector<80x128xf32>
    tpu.vector_store %arg6[%c0_3, %c0_4], %2 {strides = array<i32>} : memref<80x128xf32, #tpu.memory_space<vmem>>, vector<80x128xf32>,
    %c0_5 = arith.constant 0 : index
    %c0_6 = arith.constant 0 : index
    %4 = vector.load %arg4[%c0_5, %c0_6] : memref<1x128xf32, #tpu.memory_space<vmem>>, vector<1x128xf32>
    %5 = vector.shape_cast %4 : vector<1x128xf32> to vector<1x1x128xf32>
    %6 = vector.shape_cast %5 : vector<1x1x128xf32> to vector<1x1x128xf32>
    %7 = vector.broadcast %6 : vector<1x1x128xf32> to vector<8x10x128xf32>
    %c0_i32 = arith.constant 0 : i32
    %c80_i32 = arith.constant 80 : i32
    %8 = arith.muli %c0_i32, %c80_i32 : i32
    %9 = tpu.assume_multiple %8, 16 : i32
    %c8_i32 = arith.constant 8 : i32
    %10 = arith.muli %c0_i32, %c8_i32 : i32
    %11 = tpu.assume_multiple %10, 8 : i32
    %12 = arith.index_cast %9 : i32 to index
    %c0_7 = arith.constant 0 : index
    %13 = vector.load %arg6[%12, %c0_7] : memref<80x128xf32, #tpu.memory_space<vmem>>, vector<80x128xf32>
    %14 = vector.shape_cast %13 : vector<80x128xf32> to vector<8x10x128xf32>
    %15 = arith.index_cast %11 : i32 to index
    %c0_8 = arith.constant 0 : index
    %16 = vector.load %arg2[%15, %c0_8] : memref<8x100xf32, #tpu.memory_space<vmem>>, vector<8x100xf32>
    %17 = vector.shape_cast %16 : vector<8x100xf32> to vector<8x10x10xf32>
    %18 = vector.extract_strided_slice %17 {offsets = [0, 0, 0], sizes = [8, 10, 1], strides = [1, 1, 1]} : vector<8x10x10xf32> to vector<8x10x1xf32>
    %19 = vector.extract_strided_slice %14 {offsets = [0, 0, 0], sizes = [8, 1, 128], strides = [1, 1, 1]} : vector<8x10x128xf32> to vector<8x1x128xf32>
    %20 = vector.broadcast %18 : vector<8x10x1xf32> to vector<8x10x128xf32>
    %21 = vector.broadcast %19 : vector<8x1x128xf32> to vector<8x10x128xf32>
    %22 = arith.mulf %20, %21 : vector<8x10x128xf32>
    %23 = arith.addf %7, %22 : vector<8x10x128xf32>
    %24 = vector.extract_strided_slice %17 {offsets = [0, 0, 1], sizes = [8, 10, 1], strides = [1, 1, 1]} : vector<8x10x10xf32> to vector<8x10x1xf32>
    %25 = vector.extract_strided_slice %14 {offsets = [0, 1, 0], sizes = [8, 1, 128], strides = [1, 1, 1]} : vector<8x10x128xf32> to vector<8x1x128xf32>
    %26 = vector.broadcast %24 : vector<8x10x1xf32> to vector<8x10x128xf32>
    %27 = vector.broadcast %25 : vector<8x1x128xf32> to vector<8x10x128xf32>
    %28 = arith.mulf %26, %27 : vector<8x10x128xf32>
    %29 = arith.addf %23, %28 : vector<8x10x128xf32>
    %30 = vector.extract_strided_slice %17 {offsets = [0, 0, 2], sizes = [8, 10, 1], strides = [1, 1, 1]} : vector<8x10x10xf32> to vector<8x10x1xf32>
    %31 = vector.extract_strided_slice %14 {offsets = [0, 2, 0], sizes = [8, 1, 128], strides = [1, 1, 1]} : vector<8x10x128xf32> to vector<8x1x128xf32>
    %32 = vector.broadcast %30 : vector<8x10x1xf32> to vector<8x10x128xf32>
    %33 = vector.broadcast %31 : vector<8x1x128xf32> to vector<8x10x128xf32>
    %34 = arith.mulf %32, %33 : vector<8x10x128xf32>
    %35 = arith.addf %29, %34 : vector<8x10x128xf32>
    %36 = vector.extract_strided_slice %17 {offsets = [0, 0, 3], sizes = [8, 10, 1], strides = [1, 1, 1]} : vector<8x10x10xf32> to vector<8x10x1xf32>
    %37 = vector.extract_strided_slice %14 {offsets = [0, 3, 0], sizes = [8, 1, 128], strides = [1, 1, 1]} : vector<8x10x128xf32> to vector<8x1x128xf32>
    %38 = vector.broadcast %36 : vector<8x10x1xf32> to vector<8x10x128xf32>
    %39 = vector.broadcast %37 : vector<8x1x128xf32> to vector<8x10x128xf32>
    %40 = arith.mulf %38, %39 : vector<8x10x128xf32>
    %41 = arith.addf %35, %40 : vector<8x10x128xf32>
    %42 = vector.extract_strided_slice %17 {offsets = [0, 0, 4], sizes = [8, 10, 1], strides = [1, 1, 1]} : vector<8x10x10xf32> to vector<8x10x1xf32>
    %43 = vector.extract_strided_slice %14 {offsets = [0, 4, 0], sizes = [8, 1, 128], strides = [1, 1, 1]} : vector<8x10x128xf32> to vector<8x1x128xf32>
    %44 = vector.broadcast %42 : vector<8x10x1xf32> to vector<8x10x128xf32>
    %45 = vector.broadcast %43 : vector<8x1x128xf32> to vector<8x10x128xf32>
    %46 = arith.mulf %44, %45 : vector<8x10x128xf32>
    %47 = arith.addf %41, %46 : vector<8x10x128xf32>
    %48 = vector.extract_strided_slice %17 {offsets = [0, 0, 5], sizes = [8, 10, 1], strides = [1, 1, 1]} : vector<8x10x10xf32> to vector<8x10x1xf32>
    %49 = vector.extract_strided_slice %14 {offsets = [0, 5, 0], sizes = [8, 1, 128], strides = [1, 1, 1]} : vector<8x10x128xf32> to vector<8x1x128xf32>
    %50 = vector.broadcast %48 : vector<8x10x1xf32> to vector<8x10x128xf32>
    %51 = vector.broadcast %49 : vector<8x1x128xf32> to vector<8x10x128xf32>
    %52 = arith.mulf %50, %51 : vector<8x10x128xf32>
    %53 = arith.addf %47, %52 : vector<8x10x128xf32>
    %54 = vector.extract_strided_slice %17 {offsets = [0, 0, 6], sizes = [8, 10, 1], strides = [1, 1, 1]} : vector<8x10x10xf32> to vector<8x10x1xf32>
    %55 = vector.extract_strided_slice %14 {offsets = [0, 6, 0], sizes = [8, 1, 128], strides = [1, 1, 1]} : vector<8x10x128xf32> to vector<8x1x128xf32>
    %56 = vector.broadcast %54 : vector<8x10x1xf32> to vector<8x10x128xf32>
    %57 = vector.broadcast %55 : vector<8x1x128xf32> to vector<8x10x128xf32>
    %58 = arith.mulf %56, %57 : vector<8x10x128xf32>
    %59 = arith.addf %53, %58 : vector<8x10x128xf32>
    %60 = vector.extract_strided_slice %17 {offsets = [0, 0, 7], sizes = [8, 10, 1], strides = [1, 1, 1]} : vector<8x10x10xf32> to vector<8x10x1xf32>
    %61 = vector.extract_strided_slice %14 {offsets = [0, 7, 0], sizes = [8, 1, 128], strides = [1, 1, 1]} : vector<8x10x128xf32> to vector<8x1x128xf32>
    %62 = vector.broadcast %60 : vector<8x10x1xf32> to vector<8x10x128xf32>
    %63 = vector.broadcast %61 : vector<8x1x128xf32> to vector<8x10x128xf32>
    %64 = arith.mulf %62, %63 : vector<8x10x128xf32>
    %65 = arith.addf %59, %64 : vector<8x10x128xf32>
    %66 = vector.extract_strided_slice %17 {offsets = [0, 0, 8], sizes = [8, 10, 1], strides = [1, 1, 1]} : vector<8x10x10xf32> to vector<8x10x1xf32>
    %67 = vector.extract_strided_slice %14 {offsets = [0, 8, 0], sizes = [8, 1, 128], strides = [1, 1, 1]} : vector<8x10x128xf32> to vector<8x1x128xf32>
    %68 = vector.broadcast %66 : vector<8x10x1xf32> to vector<8x10x128xf32>
    %69 = vector.broadcast %67 : vector<8x1x128xf32> to vector<8x10x128xf32>
    %70 = arith.mulf %68, %69 : vector<8x10x128xf32>
    %71 = arith.addf %65, %70 : vector<8x10x128xf32>
    %72 = vector.extract_strided_slice %17 {offsets = [0, 0, 9], sizes = [8, 10, 1], strides = [1, 1, 1]} : vector<8x10x10xf32> to vector<8x10x1xf32>
    %73 = vector.extract_strided_slice %14 {offsets = [0, 9, 0], sizes = [8, 1, 128], strides = [1, 1, 1]} : vector<8x10x128xf32> to vector<8x1x128xf32>
    %74 = vector.broadcast %72 : vector<8x10x1xf32> to vector<8x10x128xf32>
    %75 = vector.broadcast %73 : vector<8x1x128xf32> to vector<8x10x128xf32>
    %76 = arith.mulf %74, %75 : vector<8x10x128xf32>
    %77 = arith.addf %71, %76 : vector<8x10x128xf32>
    %78 = vector.shape_cast %77 : vector<8x10x128xf32> to vector<80x128xf32>
    %79 = arith.index_cast %9 : i32 to index
    %c0_9 = arith.constant 0 : index
    %80 = vector.load %arg5[%79, %c0_9] : memref<80x128xf32, #tpu.memory_space<vmem>>, vector<80x128xf32>
    tpu.vector_store %arg5[%79, %c0_9], %78 {strides = array<i32>} : memref<80x128xf32, #tpu.memory_space<vmem>>, vector<80x128xf32>,
    %c1_i32 = arith.constant 1 : i32
    return
  }
  func.func @transform_0(%arg0: i32) -> (i32, i32) {
    %c0_i32 = arith.constant 0 : i32
    %c0_i32_0 = arith.constant 0 : i32
    return %arg0, %c0_i32 : i32, i32
  }
  func.func @transform_1(%arg0: i32) -> (i32, i32) {
    %c0_i32 = arith.constant 0 : i32
    %c0_i32_0 = arith.constant 0 : i32
    return %arg0, %c0_i32 : i32, i32
  }
  func.func @transform_2(%arg0: i32) -> (i32, i32) {
    %c0_i32 = arith.constant 0 : i32
    %c0_i32_0 = arith.constant 0 : i32
    %c0_i32_1 = arith.constant 0 : i32
    return %c0_i32, %c0_i32_0 : i32, i32
  }
  func.func @transform_3(%arg0: i32) -> (i32, i32) {
    %c0_i32 = arith.constant 0 : i32
    %c0_i32_0 = arith.constant 0 : i32
    %c0_i32_1 = arith.constant 0 : i32
    return %c0_i32, %c0_i32_0 : i32, i32
  }
  func.func @transform_4(%arg0: i32) -> (i32, i32) {
    %c0_i32 = arith.constant 0 : i32
    %c0_i32_0 = arith.constant 0 : i32
    return %arg0, %c0_i32 : i32, i32
  }
}

</mosaic_0001>

<bundles_post_ra>
// kernel: tpu_custom_call.1
= control target key start
LH: loop header
LB: loop body
LE: loop exit
PB: predicated region body
PF: predicated region fallthrough
CT: control target
= control target key end

     0   :  { %s4779_s0 = inlined_call_operand.hbm [shape: f32[160,256], index: 0, kind: input, shape index: {}]   ;;  %s4780_s1 = inlined_call_operand.hbm [shape: f32[16,100], index: 1, kind: input, shape index: {}]   ;;  %s4781_s2 = inlined_call_operand.hbm [shape: f32[256,128], index: 2, kind: input, shape index: {}]   ;;  %s4782_s3 = inlined_call_operand.hbm [shape: f32[1,128], index: 3, kind: input, shape index: {}]   ;;  %s4783_s4 = inlined_call_operand.hbm [shape: f32[160,128], index: 4, kind: output, shape index: {}]  }
   0x1   :  { %4829 = sst [smem:[#allocation62_spill]] %s4779_s0 }
   0x2   :  { %4830 = sst [smem:[#allocation63_spill]] %s4781_s2 }
   0x3   :  { %9 = vsyncpa [#allocation4], 0 }
   0x4   :  { %11 = vsyncpa [#allocation4 + $0x1], 0 }
   0x5   :  { %12 = vsyncpa [#allocation7], 0 }
   0x6   :  { %14 = vsyncpa [#allocation7 + $0x1], 0 }
   0x7   :  { %15 = vsyncpa [#allocation10], 0 }
   0x8   :  { %16 = vsyncpa [#allocation5], 0 }
   0x9   :  { %18 = vsyncpa [#allocation5 + $0x1], 0  ;;  %s3273_s15 = smov 0   ;;  %s3275_s16 = smov 0  }
   0xa   :  { %s3277_s17 = smov 0   ;;  %s3279_s18 = smov 0  }
   0xb LB: > { %s3294_s19 = sadd.s32 4294967295, %s3213_s18   ;;  %s2751_s20 = sadd.s32 4294967294, %s3213_s18   ;;  %s3213_s18 = sphi %s3279_s18, %s4951_s18   ;;  %s3209_s17 = sphi %s3277_s17, %s4950_s17   ;;  %s3205_s16 = sphi %s3275_s16, %s4949_s16   ;;  %s3201_s15 = sphi %s3273_s15, %s4948_s15  }
   0xc   : > { %p44_p0 = scmp.ne.s32.totalorder %s3205_s16, %s3201_s15  ;;  %p4784_p1 = scmp.eq.s32.totalorder %s3294_s19, 0 }
   0xd   : > { %p142_p3 = scmp.eq.s32.totalorder %s2751_s20, 1  ;;  %p2752_p5 = scmp.ge.s32.totalorder %s3213_s18, 1 }
   0xe   : > { %p3303_p4 = por %p4784_p1, %p44_p0  ;;  %p149_p7 = scmp.lt.s32.totalorder %s3213_s18, 3 }
   0xf   : > { %p3308_p6 = por %p142_p3, %p44_p0  ;;  %s3215_s24 = smov [#allocation8]  }
  0x10   : > { %s4831_s21 = scalar_select %p3303_p4, 1, 0 }
  0x11   : > { %s4832_s22 = scalar_select %p3308_p6, 1, 0 }
  0x12   : > { %p3313_p8 = pnand %p2752_p5, %p149_p7  ;;  %s161_s25 = sshll.u32 %s3215_s24, 4  ;;  %s3317_s25 = int_to_ptr.vmem [resolvable:$true] %s161_s25 }
  0x13   : > { %s3216_s27 = smov [#allocation9]   ;;  %s4835_s2 = sld [smem:[#allocation63_spill]] }
  0x14   : > { %s4833_s23 = scalar_select %p3313_p8, 1, 0 }
  0x15   : > { %p2899_p9 = pneg %p3313_p8  ;;  %s175_s28 = sshll.u32 %s3216_s27, 4  ;;  %s3328_s28 = int_to_ptr.vmem [resolvable:$true] %s175_s28 }
  0x17   : > { %p3324_p11 = pnand %p2899_p9, %p4784_p1 }
  0x19   : > { %s3019_s5 = scalar_lea.hbm %s4835_s2, 4096  ;;  %p3021_p13 = pneg %p3324_p11 }
  0x1a   : > { %p3020_p12 = scmp.ne.s32.totalorder %s4835_s2, %s3019_s5  ;;  %p3026_p5 = scmp.lt.u32.totalorder %s3019_s5, %s4835_s2 }
  0x1c   : > { %p3022_p0 = pnand %p3021_p13, %p3020_p12 }
  0x1e   : > { %p3023_p3 = pneg %p3022_p0 }
  0x20   : > { %p3028_p7 = pnand %p3026_p5, %p3023_p3 }
  0x22   : > { %3031 = shalt.err (!%p3028_p7)
}
  0x23   : > { %s3032_s10 = scalar_lea.vmem %s3317_s25, 4096  ;;  %p3040_p2 = scmp.lt.s32.totalorder %s3317_s25, %s3317_s25 }
  0x24   : > { %p3033_p9 = scmp.ne.s32.totalorder %s3317_s25, %s3032_s10  ;;  %p3041_p12 = scmp.lt.s32.totalorder %s3032_s10, %s3032_s10 }
  0x26   : > { %p3035_p10 = pnand %p3033_p9, %p3021_p13  ;;  %p3042_p0 = por %p3041_p12, %p3040_p2 }
  0x28   : > { %p3036_p1 = pneg %p3035_p10 }
  0x2a   : > { %p3043_p6 = pnand %p3042_p0, %p3036_p1 }
  0x2c   : > { %3046 = shalt.err (!%p3043_p6)
}
  0x2d   : > { %s3217_s11 = smov 128   ;;  %s3218_s12 = smov 8  }
  0x2e   : > { %2902 = dma.hbm_to_vmem [thread:$0]  (!%p3324_p11), %s4835_s2, 4096, %s3317_s25, [#allocation7], %s3217_s11, %s3217_s11, %s3218_s12  }
  0x2f   : > { %s3047_s27 = scalar_lea.hbm %s4782_s3, 16 }
  0x30   : > { %p3048_p2 = scmp.ne.s32.totalorder %s4782_s3, %s3047_s27  ;;  %p3054_p10 = scmp.lt.u32.totalorder %s3047_s27, %s4782_s3 }
  0x32   : > { %p3050_p1 = pnand %p3048_p2, %p3021_p13 }
  0x34   : > { %p3051_p6 = pneg %p3050_p1 }
  0x36   : > { %p3056_p3 = pnand %p3054_p10, %p3051_p6 }
  0x38   : > { %3059 = shalt.err (!%p3056_p3)
}
  0x39   : > { %s3060_s25 = scalar_lea.vmem %s3328_s28, 16  ;;  %s3067_s7 = scalar_lea.vmem %s3328_s28, 32 }
  0x3a   : > { %p3061_p5 = scmp.ne.s32.totalorder %s3328_s28, %s3060_s25  ;;  %p3068_p12 = scmp.lt.s32.totalorder %s3328_s28, %s3328_s28 }
  0x3b   : > { %p3069_p0 = scmp.lt.s32.totalorder %s3067_s7, %s3060_s25 }
  0x3c   : > { %p3063_p7 = pnand %p3061_p5, %p3021_p13 }
  0x3d   : > { %p3070_p2 = por %p3069_p0, %p3068_p12 }
  0x3e   : > { %p3064_p9 = pneg %p3063_p7 }
  0x40   : > { %p3071_p1 = pnand %p3070_p2, %p3064_p9 }
  0x42   : > { %3074 = shalt.err (!%p3071_p1)
}
  0x43   : > { %2905 = dma.hbm_to_vmem [thread:$0]  (!%p3324_p11), %s4782_s3, 16, %s3328_s28, [#allocation10]  }
  0x44   : > { %s3384_s10 = sadd.s32 1, %s3213_s18   ;;  %s31_s26 = sadd.s32 1, %s3209_s17 }
  0x45   : > { %s28_s11 = ssub.s32 %s3213_s18, %s3384_s10  ;;  %p38_p13 = scmp.ne.s32.totalorder %s3209_s17, %s3205_s16 }
  0x46   : > { %p29_p6 = scmp.eq.s32.totalorder %s28_s11, 0  ;;  %p39_p10 = scmp.eq.s32.totalorder %s3213_s18, 0 }
  0x47   : > { %p4836_p3 = scmp.eq.s32.totalorder %s3294_s19, 1  ;;  %p2919_p7 = scmp.lt.s32.totalorder %s3213_s18, 2 }
  0x48   : > { %s3400_s13 = scalar_select %p29_p6, %s3209_s17, %s31_s26  }
  0x49   : > { %p3394_p5 = por %p4836_p3, %p38_p13  ;;  %p40_p9 = por %p39_p10, %p38_p13 }
  0x4a   : > { %s3403_s14 = sand.u32 1, %s3209_s17   ;;  %s2771_s20 = smul.u32 2560, %s3213_s18 }
  0x4b   : > { %s4837_s12 = scalar_select %p3394_p5, 1, 0 }
  0x4c   : > { %s2882_s28 = smul.u32 160, %s3403_s14  ;;  %p3407_p11 = pnand %p2919_p7, %p40_p9 }
  0x4d   : > { %s4839_s0 = sld [smem:[#allocation62_spill]]  ;;  %s208_s25 = sand.u32 1, %s3213_s18  }
  0x4e   : > { %s190_s5 = scalar_lea.vmem [#allocation3], %s2882_s28  ;;  %s187_s7 = scalar_lea.sflag [#allocation4], %s3403_s14 }
  0x4f   : > { %s198_s6 = sshll.u32 %s190_s5, 4  ;;  %p3077_p0 = pneg %p3407_p11  ;;  %s3416_s6 = int_to_ptr.vmem [resolvable:$true] %s198_s6 }
  0x53   : > { %s3414_s30 = scalar_lea.hbm %s4839_s0, %s2771_s20  ;;  %s3080_s11 = scalar_lea.hbm %s4839_s0, 5120 }
  0x54   : > { %s3075_s8 = scalar_lea.hbm %s3414_s30, 2560  ;;  %p3081_p13 = scmp.lt.u32.totalorder %s3414_s30, %s4839_s0 }
  0x55   : > { %p3076_p12 = scmp.ne.s32.totalorder %s3414_s30, %s3075_s8  ;;  %p3082_p6 = scmp.lt.u32.totalorder %s3080_s11, %s3075_s8 }
  0x56   : > { %p3084_p3 = scmp.lt.u32.totalorder %s3075_s8, %s3414_s30 }
  0x57   : > { %p3078_p2 = pnand %p3077_p0, %p3076_p12  ;;  %p3083_p10 = por %p3082_p6, %p3081_p13 }
  0x59   : > { %p3079_p1 = pneg %p3078_p2  ;;  %p3085_p7 = por %p3084_p3, %p3083_p10 }
  0x5b   : > { %p3086_p9 = pnand %p3085_p7, %p3079_p1 }
  0x5d   : > { %3089 = shalt.err (!%p3086_p9)
}
  0x5e   : > { %s3090_s28 = scalar_lea.vmem %s3416_s6, 2560  ;;  %s3219_s29 = smov [#allocation3]  }
  0x5f   : > { %p3091_p12 = scmp.ne.s32.totalorder %s3416_s6, %s3090_s28  ;;  %s3095_s5 = sshll.u32 %s3219_s29, 4  ;;  %s3096_s5 = int_to_ptr.vmem [resolvable:$false] %s3095_s5 }
  0x60   : > { %s3097_s9 = scalar_lea.vmem %s3096_s5, 5120  ;;  %p3098_p4 = scmp.lt.s32.totalorder %s3416_s6, %s3096_s5 }
  0x61   : > { %p3093_p2 = pnand %p3091_p12, %p3077_p0  ;;  %p3099_p13 = scmp.lt.s32.totalorder %s3097_s9, %s3090_s28 }
  0x63   : > { %p3094_p5 = pneg %p3093_p2  ;;  %p3100_p6 = por %p3099_p13, %p3098_p4 }
  0x65   : > { %p3101_p10 = pnand %p3100_p6, %p3094_p5 }
  0x67   : > { %3104 = shalt.err (!%p3101_p10)
}
  0x68   : > { %s3220_s8 = smov 256   ;;  %s3221_s26 = smov 16  }
  0x69   : > { %2909 = dma.hbm_to_vmem [thread:$0]  (!%p3407_p11), %s3414_s30, 2560, %s3416_s6, %s187_s7, %s3220_s8, %s3220_s8, %s3221_s26  }
  0x6a   : > { %s2758_s11 = sshll.u32 %s3403_s14, 3  ;;  %s2759_s20 = sshll.u32 %s3213_s18, 7 }
  0x6b   : > { %s3452_s29 = scalar_lea.hbm %s4780_s1, %s2759_s20  ;;  %s212_s5 = scalar_lea.vmem [#allocation6], %s2758_s11 }
  0x6c   : > { %s219_s9 = sshll.u32 %s212_s5, 4  ;;  %s209_s0 = scalar_lea.sflag [#allocation7], %s208_s25  ;;  %s220_s9 = int_to_ptr.vmem [resolvable:$true] %s219_s9 }
  0x6d   : > { %s3105_s2 = scalar_lea.hbm %s3452_s29, 128  ;;  %s3110_s6 = scalar_lea.hbm %s4780_s1, 256 }
  0x6e   : > { %p3106_p4 = scmp.ne.s32.totalorder %s3452_s29, %s3105_s2  ;;  %p3111_p3 = scmp.lt.u32.totalorder %s3452_s29, %s4780_s1 }
  0x6f   : > { %p3112_p7 = scmp.lt.u32.totalorder %s3110_s6, %s3105_s2  ;;  %p3114_p12 = scmp.lt.u32.totalorder %s3105_s2, %s3452_s29 }
  0x70   : > { %p3108_p5 = pnand %p3106_p4, %p3077_p0 }
  0x71   : > { %p3113_p9 = por %p3112_p7, %p3111_p3 }
  0x72   : > { %p3109_p1 = pneg %p3108_p5 }
  0x73   : > { %p3115_p2 = por %p3114_p12, %p3113_p9 }
  0x75   : > { %p3116_p13 = pnand %p3115_p2, %p3109_p1 }
  0x77   : > { %3119 = shalt.err (!%p3116_p13)
}
  0x78   : > { %s3120_s25 = scalar_lea.vmem %s220_s9, 128  ;;  %s3222_s26 = smov [#allocation6]  }
  0x79   : > { %p3121_p6 = scmp.ne.s32.totalorder %s220_s9, %s3120_s25  ;;  %s3125_s11 = sshll.u32 %s3222_s26, 4  ;;  %s3126_s11 = int_to_ptr.vmem [resolvable:$false] %s3125_s11 }
  0x7a   : > { %s3127_s20 = scalar_lea.vmem %s3126_s11, 256  ;;  %p3128_p5 = scmp.lt.s32.totalorder %s220_s9, %s3126_s11 }
  0x7b   : > { %p3123_p10 = pnand %p3121_p6, %p3077_p0  ;;  %p3129_p8 = scmp.lt.s32.totalorder %s3127_s20, %s3120_s25 }
  0x7d   : > { %p3124_p4 = pneg %p3123_p10  ;;  %p3130_p3 = por %p3129_p8, %p3128_p5 }
  0x7f   : > { %p3131_p7 = pnand %p3130_p3, %p3124_p4 }
  0x81   : > { %3134 = shalt.err (!%p3131_p7)
}
  0x82   : > { %2912 = dma.hbm_to_vmem [thread:$0]  (!%p3407_p11), %s3452_s29, 128, %s220_s9, %s209_s0  }
  0x83   : > { %p4840_p1 = scmp.ne.s32.totalorder %s4833_s23, 0 }
  0x85   : > { %228 = sbr.rel (%p4840_p1) target bundleno = 806 (0x326), region = 36 }
  0x8c   : > { %s3478_s2 = sand.u32 1, %s3205_s16   ;;  %p4841_p8 = scmp.ne.s32.totalorder %s4831_s21, 0 }
  0x8d   : > { %s2883_s27 = smul.u32 160, %s3478_s2  ;;  %s231_s28 = scalar_lea.sflag [#allocation4], %s3478_s2 }
  0x8f   : > { %s3482_s5 = scalar_lea.vmem [#allocation3], %s2883_s27 }
  0x90   : > { %3180 = dma.done.wait (%p4841_p8), %s231_s28, 2560  }
  0x91   : > { %3182 = vsyncadd (%p4841_p8), %s231_s28, 4294964736  ;;  %s239_s0 = sand.u32 1, %s3294_s19   ;;  %s2761_s23 = sshll.u32 %s3478_s2, 3 }
  0x92   : > { %s240_s24 = scalar_lea.sflag [#allocation7], %s239_s0  ;;  %s243_s29 = scalar_lea.vmem [#allocation6], %s2761_s23 }
  0x93   : > { %3184 = dma.done.wait (%p4841_p8), %s240_s24, 128  }
  0x94   : > { %3186 = vsyncadd (%p4841_p8), %s240_s24, 4294967168  ;;  %p4842_p11 = scmp.eq.s32.totalorder %s3294_s19, 0 }
  0x96   : > { %3188 = dma.done.wait (%p4842_p11), [#allocation7], 4096   ;;  %p4843_p0 = pmov %p4842_p11 }
  0x98   : > { %3190 = vsyncadd (%p4843_p0), [#allocation7], 4294963200  ;;  %p4844_p9 = pmov %p4843_p0 }
  0x99   : > { %p4845_p12 = pmov %p4843_p0 }
  0x9a   : > { %3192 = dma.done.wait (%p4844_p9), [#allocation10], 16  }
  0x9b   : > { %3194 = vsyncadd (%p4845_p12), [#allocation10], 4294967280  ;;  %v3502_v0 = vld [vmem:[%s243_s29] sm:$0xff]  ;;  %v319_v1 = vld [vmem:[#allocation8 + $0x80] sm:$0xff]  ;;  %s3223_s9 = smov 98   ;;  %s3224_s21 = smov 118  }
  0x9c   : > { %v320_v2 = vld [vmem:[#allocation8 + $0x88] sm:$0xff]  ;;  %705 = vrot.lane.b32.xlu1 %v3502_v0, %s3223_s9  ;;  %699 = vrot.lane.b32.xlu0 %v3502_v0, %s3224_s21  ;;  %v303_v4 = vld [vmem:[#allocation8] sm:$0xff]  ;;  %v321_v6 = vld [vmem:[#allocation8 + $0x90] sm:$0xff]  ;;  %s3225_s14 = smov 88   ;;  %s3226_s30 = smov 108   ;;  %v3229_v27 = vmov 0  }
  0x9d   : > { %v2834_v3 = vpack.c.bf16 %v320_v2, %v319_v1  ;;  %v304_v5 = vld [vmem:[#allocation8 + $0x8] sm:$0xff]  ;;  %v322_v8 = vld [vmem:[#allocation8 + $0x98] sm:$0xff]  ;;  %v305_v9 = vld [vmem:[#allocation8 + $0x10] sm:$0xff]  ;;  %s3227_s6 = smov 68   ;;  %s3228_s7 = smov 78   ;;  %2986 = vset.pattern.permute.xlu1 %v3229_v27  ;;  %2985 = vset.pattern.permute.xlu0 %v3229_v27 }
  0x9e   : > { %v2836_v7 = vpack.c.bf16 %v304_v5, %v303_v4  ;;  %v306_v10 = vld [vmem:[#allocation8 + $0x18] sm:$0xff]  ;;  %v2838_v11 = vpack.c.bf16 %v322_v8, %v321_v6  ;;  %v323_v12 = vld [vmem:[#allocation8 + $0xa0] sm:$0xff]  ;;  %v324_v13 = vld [vmem:[#allocation8 + $0xa8] sm:$0xff]  ;;  %s3230_s8 = smov 58   ;;  %s3231_s25 = smov 48  }
  0x9f   : > { %2835 = vmatprep.subr.bf16.mxu0 %v2834_v3  ;;  %2866 = vmatprep.subr.bf16.mxu1 %v2834_v3  ;;  %v2840_v14 = vpack.c.bf16 %v306_v10, %v305_v9  ;;  %v307_v15 = vld [vmem:[#allocation8 + $0x20] sm:$0xff]  ;;  %v308_v16 = vld [vmem:[#allocation8 + $0x28] sm:$0xff]  ;;  %v2842_v17 = vpack.c.bf16 %v324_v13, %v323_v12  ;;  %v325_v18 = vld [vmem:[#allocation8 + $0xb0] sm:$0xff]  ;;  %s3232_s26 = smov 38   ;;  %v491_v13 = vlaneseq  ;;  %s2884_s11 = smul.u32 80, %s3478_s2 }
  0xa0   : > { %2837 = vmatpush3.bf16.msra.mxu0 %v2836_v7  ;;  %2874 = vmatpush3.bf16.msra.mxu1 %v2836_v7  ;;  %v326_v19 = vld [vmem:[#allocation8 + $0xb8] sm:$0xff]  ;;  %v2844_v20 = vpack.c.bf16 %v308_v16, %v307_v15  ;;  %v309_v21 = vld [vmem:[#allocation8 + $0x30] sm:$0xff]  ;;  %v327_v24 = vld [vmem:[#allocation8 + $0xc0] sm:$0xff]  ;;  %s2770_s27 = smul.u32 1280, %s3294_s19  ;;  %s2623_s19 = scalar_lea.sflag [#allocation5], %s3478_s2 }
  0xa1   : > { %708 = vrot.lane.b32.xlu1 %v3502_v0, %s3225_s14  ;;  %702 = vrot.lane.b32.xlu0 %v3502_v0, %s3226_s30  ;;  %v310_v22 = vld [vmem:[#allocation8 + $0x38] sm:$0xff]  ;;  %v2846_v23 = vpack.c.bf16 %v326_v19, %v325_v18  ;;  %v328_v25 = vld [vmem:[#allocation8 + $0xc8] sm:$0xff]  ;;  %v311_v30 = vld [vmem:[#allocation8 + $0x40] sm:$0xff]  ;;  %v3234_v19 = vmov 1934713408   ;;  %s4622_s20 = scalar_lea.vmem [#allocation11], %s2884_s11 }
  0xa2   : > { %2839 = vmatprep.subr.bf16.mxu0 %v2838_v11  ;;  %2867 = vmatprep.subr.bf16.mxu1 %v2838_v11  ;;  %v284_v26 = vld [vmem:[%s3482_s5 + $0x8] sm:$0xff]  ;;  %v2848_v28 = vpack.c.bf16 %v310_v22, %v309_v21  ;;  %v2850_v29 = vpack.c.bf16 %v328_v25, %v327_v24  ;;  %v312_v31 = vld [vmem:[#allocation8 + $0x48] sm:$0xff]  ;;  %v329_v32 = vld [vmem:[#allocation8 + $0xd0] sm:$0xff]  ;;  %v3233_v11 = vmov 1983009808   ;;  %s2636_s28 = sshll.u32 %s4622_s20, 4  ;;  %s4732_s23 = scalar_lea.hbm %s4783_s4, %s2770_s27  ;;  %s4734_s28 = int_to_ptr.vmem [resolvable:$true] %s2636_s28 }
  0xa3   : > { %399 = vmatprep.mubr.f32.mxu0 %v284_v26  ;;  %v330_v33 = vld [vmem:[#allocation8 + $0xd8] sm:$0xff]  ;;  %v294_v34 = vld [vmem:[%s3482_s5 + $0x58] sm:$0xff]  ;;  %v2852_v35 = vpack.c.bf16 %v312_v31, %v311_v30  ;;  %v313_v37 = vld [vmem:[#allocation8 + $0x50] sm:$0xff]  ;;  %v489_v12 = vunpack.c.l.s4 %v3233_v11  ;;  %s3135_s24 = scalar_lea.vmem %s4734_s28, 1280  ;;  %p4945_p13 = scmp.ne.s32.totalorder %s4837_s12, 0 }
  0xa4   : > { %2841 = vmatpush3.bf16.msra.mxu0 %v2840_v14  ;;  %2875 = vmatpush3.bf16.msra.mxu1 %v2840_v14  ;;  %v2854_v36 = vpack.c.bf16 %v330_v33, %v329_v32  ;;  %v314_v38 = vld [vmem:[#allocation8 + $0x58] sm:$0xff]  ;;  %v331_v39 = vld [vmem:[#allocation8 + $0xe0] sm:$0xff]  ;;  %v332_v40 = vld [vmem:[#allocation8 + $0xe8] sm:$0xff]  ;;  %v3235_v33 = vmov 1   ;;  %p3136_p2 = scmp.ne.s32.totalorder %s4734_s28, %s3135_s24  ;;  %s3245_s29 = smov [#allocation11]  }
  0xa5   : > { %714 = vrot.lane.b32.xlu1 %v3502_v0, %s3227_s6  ;;  %711 = vrot.lane.b32.xlu0 %v3502_v0, %s3228_s7  ;;  %v2856_v41 = vpack.c.bf16 %v314_v38, %v313_v37  ;;  %v2858_v42 = vpack.c.bf16 %v332_v40, %v331_v39  ;;  %v315_v43 = vld [vmem:[#allocation8 + $0x60] sm:$0xff]  ;;  %v316_v44 = vld [vmem:[#allocation8 + $0x68] sm:$0xff]  ;;  %v333_v45 = vld [vmem:[#allocation8 + $0xf0] sm:$0xff]  ;;  %v490_v16 = vunpack.c.0.s8 %v489_v12  ;;  %v3238_v38 = vmov 3   ;;  %s3139_s9 = sshll.u32 %s3245_s29, 4  ;;  %s3140_s9 = int_to_ptr.vmem [resolvable:$false] %s3139_s9 }
  0xa6   : > { %2843 = vmatprep.subr.bf16.mxu0 %v2842_v17  ;;  %2868 = vmatprep.subr.bf16.mxu1 %v2842_v17  ;;  %v334_v46 = vld [vmem:[#allocation8 + $0xf8] sm:$0xff]  ;;  %v2860_v47 = vpack.c.bf16 %v316_v44, %v315_v43  ;;  %v317_v49 = vld [vmem:[#allocation8 + $0x70] sm:$0xff]  ;;  %v286_v53 = vld [vmem:[%s3482_s5 + $0x18] sm:$0xff]  ;;  %v3547_v17 = vshrl.u32 %v491_v13, 7  ;;  %p3137_p6 = pnand %p3136_p2, %p4945_p13  ;;  %s3141_s21 = scalar_lea.vmem %s3140_s9, 2560 }
  0xa7   : > { %424 = vmatprep.mubr.f32.mxu1 %v294_v34  ;;  %v2862_v48 = vpack.c.bf16 %v334_v46, %v333_v45  ;;  %v318_v50 = vld [vmem:[#allocation8 + $0x78] sm:$0xff]  ;;  %v283_v52 = vld [vmem:[%s3482_s5] sm:$0xff]  ;;  %v293_v54 = vld [vmem:[%s3482_s5 + $0x50] sm:$0xff]  ;;  %v3236_v34 = vmov 2   ;;  %p3142_p4 = scmp.lt.s32.totalorder %s4734_s28, %s3140_s9  ;;  %p3143_p5 = scmp.lt.s32.totalorder %s3141_s21, %s3135_s24 }
  0xa8   : > { %2845 = vmatpush3.bf16.msra.mxu0 %v2844_v20  ;;  %2876 = vmatpush3.bf16.msra.mxu1 %v2844_v20  ;;  %v2864_v51 = vpack.c.bf16 %v318_v50, %v317_v49  ;;  %v296_v55 = vld [vmem:[%s3482_s5 + $0x68] sm:$0xff]  ;;  %v285_v56 = vld [vmem:[%s3482_s5 + $0x10] sm:$0xff]  ;;  %v295_v58 = vld [vmem:[%s3482_s5 + $0x60] sm:$0xff]  ;;  %v793_v20 = vunpack.c.l.s4 %v3234_v19  ;;  %v3552_v22 = vsub.s32 %v490_v16, %v3547_v17  ;;  %p3138_p10 = pneg %p3137_p6 }
  0xa9   : > { %717 = vrot.lane.b32.xlu0 %v3502_v0, %s3230_s8  ;;  %720 = vrot.lane.b32.xlu1 %v3502_v0, %s3231_s25  ;;  %v288_v57 = vld [vmem:[%s3482_s5 + $0x28] sm:$0xff]  ;;  %v298_v59 = vld [vmem:[%s3482_s5 + $0x78] sm:$0xff]  ;;  %p3144_p3 = por %p3143_p5, %p3142_p4 }
  0xaa   : > { %2847 = vmatprep.subr.bf16.mxu0 %v2846_v23  ;;  %2869 = vmatprep.subr.bf16.mxu1 %v2846_v23  ;;  %v287_v60 = vld [vmem:[%s3482_s5 + $0x20] sm:$0xff]  ;;  %v290_v61 = vld [vmem:[%s3482_s5 + $0x38] sm:$0xff]  ;;  %v297_v62 = vld [vmem:[%s3482_s5 + $0x70] sm:$0xff]  ;;  %v794_v25 = vunpack.c.0.s8 %v793_v20 }
  0xab   : > { %v300_v63 = vld [vmem:[%s3482_s5 + $0x88] sm:$0xff]  ;;  %v289_v1 = vld [vmem:[%s3482_s5 + $0x30] sm:$0xff]  ;;  %v299_v3 = vld [vmem:[%s3482_s5 + $0x80] sm:$0xff]  ;;  %p3145_p7 = pnand %p3144_p3, %p3138_p10 }
  0xac   : > { %2849 = vmatpush3.bf16.msra.mxu0 %v2848_v28  ;;  %2877 = vmatpush3.bf16.msra.mxu1 %v2848_v28  ;;  %v292_v2 = vld [vmem:[%s3482_s5 + $0x48] sm:$0xff]  ;;  %v302_v4 = vld [vmem:[%s3482_s5 + $0x98] sm:$0xff]  ;;  %v291_v5 = vld [vmem:[%s3482_s5 + $0x40] sm:$0xff]  ;;  %v3557_v30 = vsub.s32 %v794_v25, %v3547_v17 }
  0xad   : > { %723 = vrot.lane.b32.xlu0 %v3502_v0, %s3232_s26  ;;  %2851 = vmatprep.subr.bf16.mxu0 %v2850_v29  ;;  %v301_v6 = vld [vmem:[%s3482_s5 + $0x90] sm:$0xff] }
  0xae   : > { %2870 = vmatprep.subr.bf16.mxu1 %v2850_v29 }
  0xb0   : > { %2853 = vmatpush3.bf16.msra.mxu0 %v2852_v35  ;;  %2878 = vmatpush3.bf16.msra.mxu1 %v2852_v35  ;;  %v3237_v35 = vmov 0.0  }
  0xb1   : > { %2855 = vmatprep.subr.bf16.mxu0 %v2854_v36  ;;  %2871 = vmatprep.subr.bf16.mxu1 %v2854_v36 }
  0xb4   : > { %2857 = vmatpush3.bf16.msra.mxu0 %v2856_v41  ;;  %2879 = vmatpush3.bf16.msra.mxu1 %v2856_v41 }
  0xb5   : > { %2859 = vmatprep.subr.bf16.mxu0 %v2858_v42  ;;  %2872 = vmatprep.subr.bf16.mxu1 %v2858_v42 }
  0xb8   : > { %2861 = vmatpush3.bf16.msra.mxu0 %v2860_v47  ;;  %2880 = vmatpush3.bf16.msra.mxu1 %v2860_v47 }
  0xb9   : > { %2863 = vmatprep.subr.bf16.mxu0 %v2862_v48  ;;  %2873 = vmatprep.subr.bf16.mxu1 %v2862_v48 }
  0xbc   : > { %2865 = vmatpush3.bf16.msra.mxu0 %v2864_v51  ;;  %2881 = vmatpush3.bf16.msra.mxu1 %v2864_v51 }
  0xbf   : > { %400 = vmatmul.mubr.f32.vlgmr.msra.gmra.mrb[0].mxu0 %v283_v52  ;;  %425 = vmatmul.mubr.f32.vlgmr.msra.gmra.mrb[0].mxu1 %v293_v54 }
  0xc0   : > { %404 = vmatprep.mubr.f32.mxu0 %v286_v53  ;;  %429 = vmatprep.mubr.f32.mxu1 %v296_v55 }
  0xc3   : > { %405 = vmatmul.mubr.f32.gmra.mrb[2].mxu0 %v285_v56  ;;  %430 = vmatmul.mubr.f32.gmra.mrb[2].mxu1 %v295_v58 }
  0xc4   : > { %409 = vmatprep.mubr.f32.mxu0 %v288_v57  ;;  %434 = vmatprep.mubr.f32.mxu1 %v298_v59 }
  0xc7   : > { %410 = vmatmul.mubr.f32.gmra.mrb[4].mxu0 %v287_v60  ;;  %435 = vmatmul.mubr.f32.gmra.mrb[4].mxu1 %v297_v62 }
  0xc8   : > { %414 = vmatprep.mubr.f32.mxu0 %v290_v61  ;;  %439 = vmatprep.mubr.f32.mxu1 %v300_v63 }
  0xcb   : > { %415 = vmatmul.mubr.f32.gmra.mrb[6].mxu0 %v289_v1  ;;  %440 = vmatmul.mubr.f32.gmra.mrb[6].mxu1 %v299_v3 }
  0xcc   : > { %419 = vmatprep.mubr.f32.mxu0 %v292_v2  ;;  %444 = vmatprep.mubr.f32.mxu1 %v302_v4 }
  0xcf   : > { %420 = vmatmul.mubr.f32.gmra.mrb[8].mxu0 %v291_v5  ;;  %445 = vmatmul.mubr.f32.gmra.mrb[8].mxu1 %v301_v6 }
 0x10e   : > { %v3535_v7 = vpop.permute.xlu1 %705  ;;  %v3537_v8 = vpop.permute.xlu0 %699 }
 0x10f   : > { %v742_v49 = vcombine.low %v3537_v8, %v3535_v7  ;;  %v743_v60 = vcombine.high %v3537_v8, %v3535_v7 }
 0x111   : > { %v750_v54 = vrot.slane %v742_v49, %v3552_v22  ;;  %v757_v2 = vrot.slane %v743_v60, %v3552_v22 }
 0x113   : > { %v3539_v9 = vpop.permute.xlu1 %708  ;;  %v3541_v10 = vpop.permute.xlu0 %702 }
 0x114   : > { %v726_v45 = vcombine.low %v3502_v0, %v3541_v10  ;;  %v727_v57 = vcombine.high %v3502_v0, %v3541_v10 }
 0x116   : > { %v734_v51 = vrot.slane %v726_v45, %v3552_v22  ;;  %v741_v0 = vrot.slane %v727_v57, %v3552_v22 }
 0x117   : > { %v3543_v14 = vpop.permute.xlu0 %711  ;;  %v3545_v15 = vpop.permute.xlu1 %714 }
 0x118   : > { %v758_v46 = vcombine.low %v3539_v9, %v3545_v15  ;;  %v791_v58 = vcombine.high %v734_v51, %v750_v54  ;;  %v759_v59 = vcombine.high %v3539_v9, %v3545_v15  ;;  %v806_v5 = vcombine.low %v741_v0, %v757_v2 }
 0x119   : > { %v790_v9 = vcombine.low %v734_v51, %v750_v54  ;;  %v807_v15 = vcombine.high %v741_v0, %v757_v2 }
 0x11a   : > { %v766_v52 = vrot.slane %v758_v46, %v3552_v22  ;;  %v805_v63 = vrot.slane %v791_v58, %v3557_v30  ;;  %v773_v1 = vrot.slane %v759_v59, %v3552_v22  ;;  %v814_v10 = vrot.slane %v806_v5, %v3557_v30 }
 0x11b   : > { %v3549_v18 = vpop.permute.xlu0 %717  ;;  %v721_v21 = vpop.permute.xlu1 %720  ;;  %v821_v20 = vrot.slane %v807_v15, %v3557_v30 }
 0x11c   : > { %v869_v23 = vrot.slane %v721_v21, %v3552_v22  ;;  %v862_v36 = vcombine.high %v721_v21, %v3237_v35  ;;  %v774_v44 = vcombine.low %v3543_v14, %v3549_v18  ;;  %v775_v55 = vcombine.high %v3543_v14, %v3549_v18 }
 0x11d   : > { %v798_v14 = vrot.slane %v790_v9, %v3557_v30 }
 0x11e   : > { %v876_v39 = vrot.slane %v862_v36, %v3552_v22  ;;  %v782_v50 = vrot.slane %v774_v44, %v3552_v22  ;;  %v789_v61 = vrot.slane %v775_v55, %v3552_v22 }
 0x11f   : > { %v724_v24 = vpop.permute.xlu0 %723 }
 0x120   : > { %v884_v26 = vrot.slane %v724_v24, %v3552_v22  ;;  %v877_v37 = vcombine.high %v724_v24, %v3237_v35  ;;  %v823_v56 = vcombine.high %v766_v52, %v782_v50  ;;  %v838_v3 = vcombine.low %v773_v1, %v789_v61 }
 0x121   : > { %v822_v6 = vcombine.low %v766_v52, %v782_v50  ;;  %v839_v12 = vcombine.high %v773_v1, %v789_v61  ;;  %v3239_v1 = vmov 4  }
 0x122   : > { %v892_v28 = vcombine.low %v869_v23, %v884_v26  ;;  %v893_v29 = vcombine.high %v869_v23, %v884_v26  ;;  %v891_v40 = vrot.slane %v877_v37, %v3552_v22  ;;  %v837_v62 = vrot.slane %v823_v56, %v3557_v30 }
 0x123   : > { %v846_v7 = vrot.slane %v838_v3, %v3557_v30  ;;  %v830_v11 = vrot.slane %v822_v6, %v3557_v30  ;;  %v853_v16 = vrot.slane %v839_v12, %v3557_v30 }
 0x124   : > { %v3560_v31 = vrot.slane %v892_v28, %v3557_v30  ;;  %v3563_v32 = vrot.slane %v893_v29, %v3557_v30  ;;  %v908_v42 = vcombine.low %v876_v39, %v891_v40  ;;  %v909_v47 = vcombine.high %v876_v39, %v891_v40 }
 0x125   : > { %v3637_v4 = vcombine.low %v805_v63, %v837_v62  ;;  %v3643_v8 = vcombine.high %v805_v63, %v837_v62  ;;  %v3649_v13 = vcombine.low %v814_v10, %v846_v7  ;;  %v3655_v18 = vcombine.low %v798_v14, %v830_v11 }
 0x126   : > { %4846 = vst [vmem:[#allocation17_spill] sm:$0xff] %v3563_v32  ;;  %955 = vperm.xlu1 %2986, %v3563_v32   ;;  %935 = vperm.xlu0 %2985, %v3560_v31   ;;  %v3585_v41 = vcombine.high %v3560_v31, %v3237_v35  ;;  %v3593_v43 = vcombine.high %v3563_v32, %v3237_v35 }
 0x127   : > { %v3604_v48 = vrot.slane %v908_v42, %v3557_v30  ;;  %v3614_v53 = vrot.slane %v909_v47, %v3557_v30  ;;  %4851 = vst [vmem:[#allocation22_spill] sm:$0xff] %v3649_v13  ;;  %4852 = vst [vmem:[#allocation23_spill] sm:$0xff] %v3655_v18  ;;  %v3657_v19 = vcombine.high %v814_v10, %v846_v7 }
 0x128   : > { %4847 = vst [vmem:[#allocation18_spill] sm:$0xff] %v3585_v41  ;;  %4848 = vst [vmem:[#allocation19_spill] sm:$0xff] %v3593_v43  ;;  %v3663_v21 = vcombine.high %v798_v14, %v830_v11  ;;  %v3665_v23 = vcombine.low %v821_v20, %v853_v16  ;;  %v3669_v24 = vcombine.high %v821_v20, %v853_v16  ;;  %v3775_v16 = vsub.s32 0, %v3547_v17 }
 0x129   : > { %4849 = vst [vmem:[#allocation20_spill] sm:$0xff] %v3604_v48  ;;  %4850 = vst [vmem:[#allocation21_spill] sm:$0xff] %v3614_v53  ;;  %v3673_v25 = vcombine.high %v3604_v48, %v3237_v35 }
 0x12a   : > { %2987 = vset.pattern.permute.xlu1 %v3235_v33  ;;  %2988 = vset.pattern.permute.xlu0 %v3235_v33  ;;  %4853 = vst [vmem:[#allocation24_spill] sm:$0xff] %v3657_v19  ;;  %4854 = vst [vmem:[#allocation25_spill] sm:$0xff] %v3665_v23 }
 0x12b   : > { %1077 = vperm.xlu1 %2987, %v3560_v31   ;;  %1093 = vperm.xlu0 %2988, %v3563_v32   ;;  %4855 = vst [vmem:[#allocation26_spill] sm:$0xff] %v3669_v24 }
 0x12f   : > { %2990 = vset.pattern.permute.xlu1 %v3236_v34  ;;  %2989 = vset.pattern.permute.xlu0 %v3236_v34 }
 0x130   : > { %1221 = vperm.xlu1 %2990, %v3563_v32   ;;  %1205 = vperm.xlu0 %2989, %v3560_v31  }
 0x134   : > { %2991 = vset.pattern.permute.xlu1 %v3238_v38  ;;  %2992 = vset.pattern.permute.xlu0 %v3238_v38 }
 0x135   : > { %1333 = vperm.xlu1 %2991, %v3560_v31   ;;  %1349 = vperm.xlu0 %2992, %v3563_v32  }
 0x139   : > { %2993 = vset.pattern.permute.xlu1 %v3229_v27  ;;  %2994 = vset.pattern.permute.xlu0 %v3235_v33 }
 0x13a   : > { %1085 = vperm.xlu0 %2994, %v3585_v41   ;;  %945 = vperm.xlu1 %2993, %v3585_v41  }
 0x13e   : > { %1101 = vperm.xlu0 %2994, %v3593_v43   ;;  %965 = vperm.xlu1 %2993, %v3593_v43  }
 0x142   : > { %1109 = vperm.xlu0 %2994, %v3604_v48   ;;  %975 = vperm.xlu1 %2993, %v3604_v48  }
 0x146   : > { %1125 = vperm.xlu0 %2994, %v3614_v53   ;;  %995 = vperm.xlu1 %2993, %v3614_v53  }
 0x14a   : > { %2996 = vset.pattern.permute.xlu0 %v3238_v38  ;;  %2995 = vset.pattern.permute.xlu1 %v3236_v34 }
 0x14b   : > { %1341 = vperm.xlu0 %2996, %v3585_v41   ;;  %1213 = vperm.xlu1 %2995, %v3585_v41  }
 0x14f   : > { %2998 = vset.pattern.permute.xlu0 %v3229_v27  ;;  %1229 = vperm.xlu1 %2995, %v3593_v43  }
 0x150   : > { %950 = vperm.xlu0 %2998, %v3637_v4  }
 0x153   : > { %1237 = vperm.xlu1 %2995, %v3604_v48  }
 0x154   : > { %960 = vperm.xlu0 %2998, %v3643_v8  }
 0x157   : > { %1253 = vperm.xlu1 %2995, %v3614_v53  }
 0x158   : > { %970 = vperm.xlu0 %2998, %v3649_v13  }
 0x15b   : > { %2997 = vset.pattern.permute.xlu1 %v3229_v27  ;;  %v3679_v27 = vcombine.high %v3614_v53, %v3237_v35 }
 0x15c   : > { %980 = vperm.xlu0 %2998, %v3657_v19   ;;  %930 = vperm.xlu1 %2997, %v3655_v18  }
 0x15d   : > { %4856 = vst [vmem:[#allocation27_spill] sm:$0xff] %v3679_v27 }
 0x160   : > { %990 = vperm.xlu0 %2998, %v3665_v23   ;;  %940 = vperm.xlu1 %2997, %v3663_v21  }
 0x164   : > { %1000 = vperm.xlu0 %2998, %v3669_v24   ;;  %985 = vperm.xlu1 %2997, %v3673_v25  }
 0x168   : > { %2999 = vset.pattern.permute.xlu0 %v3235_v33  ;;  %1005 = vperm.xlu1 %2997, %v3679_v27  }
 0x169   : > { %1073 = vperm.xlu0 %2999, %v3655_v18  }
 0x16c   : > { %3000 = vset.pattern.permute.xlu1 %v3235_v33 }
 0x16d   : > { %1117 = vperm.xlu0 %2999, %v3673_v25   ;;  %1081 = vperm.xlu1 %3000, %v3663_v21  }
 0x171   : > { %1133 = vperm.xlu0 %2999, %v3679_v27   ;;  %1089 = vperm.xlu1 %3000, %v3637_v4  }
 0x175   : > { %3002 = vset.pattern.permute.xlu0 %v3236_v34  ;;  %1097 = vperm.xlu1 %3000, %v3643_v8  }
 0x176   : > { %1217 = vperm.xlu0 %3002, %v3637_v4  }
 0x179   : > { %1105 = vperm.xlu1 %3000, %v3649_v13  }
 0x17a   : > { %1225 = vperm.xlu0 %3002, %v3643_v8  }
 0x17d   : > { %1113 = vperm.xlu1 %3000, %v3657_v19  }
 0x17e   : > { %1233 = vperm.xlu0 %3002, %v3649_v13  }
 0x181   : > { %1121 = vperm.xlu1 %3000, %v3665_v23  }
 0x182   : > { %1241 = vperm.xlu0 %3002, %v3657_v19  }
 0x185   : > { %1129 = vperm.xlu1 %3000, %v3669_v24  }
 0x186   : > { %1249 = vperm.xlu0 %3002, %v3665_v23  }
 0x189   : > { %3001 = vset.pattern.permute.xlu1 %v3236_v34 }
 0x18a   : > { %1257 = vperm.xlu0 %3002, %v3669_v24   ;;  %1201 = vperm.xlu1 %3001, %v3655_v18  }
 0x18e   : > { %3003 = vset.pattern.permute.xlu0 %v3238_v38  ;;  %1209 = vperm.xlu1 %3001, %v3663_v21  }
 0x18f   : > { %1329 = vperm.xlu0 %3003, %v3655_v18  }
 0x192   : > { %v2804_v26 = vpop.f32.mrb[0].mxu0  ;;  %1245 = vperm.xlu1 %3001, %v3673_v25   ;;  %v2819_v30 = vpop.f32.mrb[0].mxu1 }
 0x193   : > { %v2805_v28 = vpop.f32.mrb[1].mxu0  ;;  %1357 = vperm.xlu0 %3003, %v3593_v43   ;;  %v2820_v33 = vpop.f32.mrb[1].mxu1 }
 0x194   : > { %v3707_v29 = vadd.f32 %v2805_v28, %v2804_v26  ;;  %v3710_v35 = vadd.f32 %v2820_v33, %v2819_v30  ;;  %v3780_v28 = vsub.s32 1, %v3547_v17 }
 0x196   : > { %v2807_v34 = vpop.f32.mrb[2].mxu0  ;;  %1261 = vperm.xlu1 %3001, %v3679_v27   ;;  %v2822_v39 = vpop.f32.mrb[2].mxu1  ;;  %v579_v14 = vrot.slane %v3710_v35, %v3552_v22 }
 0x197   : > { %v2808_v36 = vpop.f32.mrb[3].mxu0  ;;  %1365 = vperm.xlu0 %3003, %v3604_v48   ;;  %v2823_v40 = vpop.f32.mrb[3].mxu1 }
 0x198   : > { %v3713_v37 = vadd.f32 %v2808_v36, %v2807_v34  ;;  %v3716_v44 = vadd.f32 %v2823_v40, %v2822_v39  ;;  %v3783_v30 = vrot.slane %v579_v14, %v3775_v16  ;;  %v3790_v34 = vrot.slane %v579_v14, %v3780_v28 }
 0x19a   : > { %v2810_v42 = vpop.f32.mrb[4].mxu0  ;;  %3004 = vset.pattern.permute.xlu1 %v3238_v38  ;;  %v2825_v47 = vpop.f32.mrb[4].mxu1 }
 0x19b   : > { %v2811_v45 = vpop.f32.mrb[5].mxu0  ;;  %1373 = vperm.xlu0 %3003, %v3673_v25   ;;  %1337 = vperm.xlu1 %3004, %v3663_v21   ;;  %v2826_v49 = vpop.f32.mrb[5].mxu1 }
 0x19c   : > { %v3719_v46 = vadd.f32 %v2811_v45, %v2810_v42  ;;  %v3723_v52 = vadd.f32 %v2826_v49, %v2825_v47  ;;  %v3793_v42 = vld [vmem:[#allocation9] ss:$0 sm:$0xff]  ;;  %v3240_v49 = vmov 5  }
 0x19e   : > { %4857 = vst [vmem:[#allocation28_spill] sm:$0xff] %v3719_v46  ;;  %v2813_v50 = vpop.f32.mrb[6].mxu0  ;;  %4858 = vst [vmem:[#allocation29_spill] sm:$0xff] %v3723_v52  ;;  %v2828_v55 = vpop.f32.mrb[6].mxu1 }
 0x19f   : > { %v2814_v51 = vpop.f32.mrb[7].mxu0  ;;  %1381 = vperm.xlu0 %3003, %v3614_v53   ;;  %1345 = vperm.xlu1 %3004, %v3637_v4   ;;  %v2829_v38 = vpop.f32.mrb[7].mxu1 }
 0x1a0   : > { %v3725_v54 = vadd.f32 %v2814_v51, %v2813_v50  ;;  %v3729_v58 = vadd.f32 %v2829_v38, %v2828_v55 }
 0x1a2   : > { %v2816_v56 = vpop.f32.mrb[8].mxu0  ;;  %4859 = vst [vmem:[#allocation30_spill] sm:$0xff] %v3729_v58  ;;  %v2831_v60 = vpop.f32.mrb[8].mxu1  ;;  %v538_v10 = vcombine.high %v3725_v54, %v3725_v54 }
 0x1a3   : > { %v2817_v57 = vpop.f32.mrb[9].mxu0  ;;  %1389 = vperm.xlu0 %3003, %v3679_v27   ;;  %1353 = vperm.xlu1 %3004, %v3643_v8   ;;  %v2832_v61 = vpop.f32.mrb[9].mxu1 }
 0x1a4   : > { %v3731_v59 = vadd.f32 %v2817_v57, %v2816_v56  ;;  %v3739_v63 = vadd.f32 %v2832_v61, %v2831_v60  ;;  %v3772_v15 = vrot.slane %v538_v10, %v3552_v22 }
 0x1a5   : > { %v3735_v62 = vpop.permute.xlu1 %955  ;;  %v3737_v0 = vpop.permute.xlu0 %935 }
 0x1a6   : > { %4860 = vst [vmem:[#allocation31_spill] sm:$0xff] %v3731_v59  ;;  %4861 = vst [vmem:[#allocation32_spill] sm:$0xff] %v3735_v62  ;;  %v554_v33 = vcombine.high %v3772_v15, %v3772_v15  ;;  %v3809_v56 = vrot.slane %v3731_v59, %v3552_v22 }
 0x1a7   : > { %4862 = vst [vmem:[#allocation33_spill] sm:$0xff] %v3739_v63  ;;  %3006 = vset.pattern.permute.xlu0 %v3239_v1  ;;  %1361 = vperm.xlu1 %3004, %v3649_v13   ;;  %4868 = vst [vmem:[#allocation39_spill] sm:$0xff] %v3772_v15 }
 0x1a8   : > { %1461 = vperm.xlu0 %3006, %v3560_v31   ;;  %v3796_v17 = vrot.slane %v554_v33, %v3775_v16  ;;  %v1151_v57 = vrot.slane %v554_v33, %v3780_v28  ;;  %v3821_v10 = vrot.slane %v3809_v56, %v3775_v16 }
 0x1aa   : > { %v3743_v2 = vpop.permute.xlu1 %1077  ;;  %v3745_v3 = vpop.permute.xlu0 %1093 }
 0x1ab   : > { %4863 = vst [vmem:[#allocation34_spill] sm:$0xff] %v3745_v3  ;;  %1369 = vperm.xlu1 %3004, %v3657_v19  }
 0x1ac   : > { %1473 = vperm.xlu0 %3006, %v3637_v4  }
 0x1af   : > { %v3749_v5 = vpop.permute.xlu1 %1221  ;;  %v3751_v6 = vpop.permute.xlu0 %1205  ;;  %1377 = vperm.xlu1 %3004, %v3665_v23  }
 0x1b0   : > { %4864 = vst [vmem:[#allocation35_spill] sm:$0xff] %v3749_v5  ;;  %1481 = vperm.xlu0 %3006, %v3643_v8  }
 0x1b3   : > { %1385 = vperm.xlu1 %3004, %v3669_v24  }
 0x1b4   : > { %v3756_v7 = vpop.permute.xlu1 %1333  ;;  %v3758_v9 = vpop.permute.xlu0 %1349  ;;  %1489 = vperm.xlu0 %3006, %v3649_v13  }
 0x1b5   : > { %4865 = vst [vmem:[#allocation36_spill] sm:$0xff] %v3758_v9 }
 0x1b7   : > { %3005 = vset.pattern.permute.xlu1 %v3239_v1 }
 0x1b8   : > { %1497 = vperm.xlu0 %3006, %v3657_v19   ;;  %1457 = vperm.xlu1 %3005, %v3655_v18  }
 0x1b9   : > { %v3765_v11 = vpop.permute.xlu0 %1085  ;;  %v3767_v12 = vpop.permute.xlu1 %945 }
 0x1ba   : > { %4866 = vst [vmem:[#allocation37_spill] sm:$0xff] %v3765_v11  ;;  %4867 = vst [vmem:[#allocation38_spill] sm:$0xff] %v3767_v12 }
 0x1bc   : > { %1505 = vperm.xlu0 %3006, %v3665_v23   ;;  %1465 = vperm.xlu1 %3005, %v3663_v21  }
 0x1bd   : > { %v1102_v20 = vpop.permute.xlu0 %1101  ;;  %v966_v26 = vpop.permute.xlu1 %965 }
 0x1be   : > { %v1047_v38 = vmul.f32 %v3796_v17, %v966_v26  ;;  %v3823_v26 = vcombine.high %v579_v14, %v579_v14 }
 0x1c0   : > { %1513 = vperm.xlu0 %3006, %v3669_v24   ;;  %1469 = vperm.xlu1 %3005, %v3585_v41   ;;  %v1063_v1 = vadd.f32 %v3793_v42, %v1047_v38 }
 0x1c1   : > { %v1110_v36 = vpop.permute.xlu0 %1109  ;;  %v976_v39 = vpop.permute.xlu1 %975 }
 0x1c2   : > { %v1049_v40 = vmul.f32 %v3783_v30, %v976_v39  ;;  %v1177_v45 = vmul.f32 %v3790_v34, %v1110_v36  ;;  %v1175_v36 = vmul.f32 %v1151_v57, %v1102_v20 }
 0x1c4   : > { %v1065_v47 = vadd.f32 %v3793_v42, %v1049_v40  ;;  %3007 = vset.pattern.permute.xlu0 %v3240_v49  ;;  %1477 = vperm.xlu1 %3005, %v3563_v32   ;;  %v1191_v39 = vadd.f32 %v1175_v36, %v1063_v1 }
 0x1c5   : > { %v3801_v50 = vpop.permute.xlu0 %1125  ;;  %v3803_v51 = vpop.permute.xlu1 %995  ;;  %1585 = vperm.xlu0 %3007, %v3655_v18  }
 0x1c6   : > { %v1193_v55 = vadd.f32 %v1177_v45, %v1065_v47  ;;  %v3832_v47 = vrot.slane %v3823_v26, %v3775_v16 }
 0x1c8   : > { %1485 = vperm.xlu1 %3005, %v3593_v43   ;;  %4871 = vst [vmem:[#allocation42_spill] sm:$0xff] %v3832_v47 }
 0x1c9   : > { %1597 = vperm.xlu0 %3007, %v3585_v41  }
 0x1ca   : > { %v3814_v60 = vpop.permute.xlu0 %1341  ;;  %v3816_v61 = vpop.permute.xlu1 %1213 }
 0x1cb   : > { %4869 = vst [vmem:[#allocation40_spill] sm:$0xff] %v3814_v60  ;;  %4870 = vst [vmem:[#allocation41_spill] sm:$0xff] %v3816_v61  ;;  %v3241_v60 = vmov 6  }
 0x1cc   : > { %1493 = vperm.xlu1 %3005, %v3604_v48  }
 0x1cd   : > { %1605 = vperm.xlu0 %3007, %v3563_v32  }
 0x1ce   : > { %v1230_v33 = vpop.permute.xlu1 %1229 }
 0x1cf   : > { %v1303_v40 = vmul.f32 %v3821_v10, %v1230_v33  ;;  %v3828_v45 = vpop.permute.xlu0 %950 }
 0x1d0   : > { %1501 = vperm.xlu1 %3005, %v3673_v25  }
 0x1d1   : > { %v3835_v38 = vadd.f32 %v1303_v40, %v1191_v39  ;;  %1613 = vperm.xlu0 %3007, %v3593_v43  }
 0x1d2   : > { %v1238_v14 = vpop.permute.xlu1 %1237 }
 0x1d3   : > { %v1305_v20 = vmul.f32 %v3832_v47, %v1238_v14  ;;  %v961_v15 = vpop.permute.xlu0 %960 }
 0x1d4   : > { %1509 = vperm.xlu1 %3005, %v3614_v53   ;;  %v1046_v3 = vmul.f32 %v3796_v17, %v961_v15 }
 0x1d5   : > { %v3840_v1 = vadd.f32 %v1305_v20, %v1193_v55  ;;  %1621 = vperm.xlu0 %3007, %v3604_v48  }
 0x1d6   : > { %v3843_v36 = vpop.permute.xlu1 %1253  ;;  %v1062_v12 = vadd.f32 %v3793_v42, %v1046_v3 }
 0x1d7   : > { %v3845_v33 = vpop.permute.xlu0 %970 }
 0x1d8   : > { %1517 = vperm.xlu1 %3005, %v3679_v27  }
 0x1d9   : > { %1629 = vperm.xlu0 %3007, %v3673_v25  }
 0x1db   : > { %v3849_v39 = vpop.permute.xlu0 %980  ;;  %v3851_v40 = vpop.permute.xlu1 %930 }
 0x1dc   : > { %4872 = vst [vmem:[#allocation43_spill] sm:$0xff] %v3851_v40  ;;  %3008 = vset.pattern.permute.xlu1 %v3240_v49 }
 0x1dd   : > { %1637 = vperm.xlu0 %3007, %v3614_v53   ;;  %1589 = vperm.xlu1 %3008, %v3560_v31  }
 0x1df   : > { %v3855_v55 = vpop.permute.xlu0 %990  ;;  %v3857_v14 = vpop.permute.xlu1 %940 }
 0x1e0   : > { %4873 = vst [vmem:[#allocation44_spill] sm:$0xff] %v3855_v55  ;;  %4874 = vst [vmem:[#allocation45_spill] sm:$0xff] %v3857_v14 }
 0x1e1   : > { %1645 = vperm.xlu0 %3007, %v3679_v27   ;;  %1593 = vperm.xlu1 %3008, %v3663_v21  }
 0x1e3   : > { %v1001_v20 = vpop.permute.xlu0 %1000  ;;  %v3861_v59 = vpop.permute.xlu1 %985 }
 0x1e5   : > { %3010 = vset.pattern.permute.xlu0 %v3241_v60  ;;  %1601 = vperm.xlu1 %3008, %v3637_v4  }
 0x1e6   : > { %1717 = vperm.xlu0 %3010, %v3560_v31  }
 0x1e7   : > { %v3865_v49 = vpop.permute.xlu1 %1005 }
 0x1e8   : > { %v3867_v9 = vpop.permute.xlu0 %1073 }
 0x1e9   : > { %4875 = vst [vmem:[#allocation46_spill] sm:$0xff] %v3867_v9  ;;  %1609 = vperm.xlu1 %3008, %v3643_v8   ;;  %v623_v9 = vcombine.high %v3729_v58, %v3729_v58 }
 0x1ea   : > { %1729 = vperm.xlu0 %3010, %v3637_v4  }
 0x1eb   : > { %v3892_v55 = vrot.slane %v623_v9, %v3552_v22 }
 0x1ec   : > { %v3871_v14 = vpop.permute.xlu0 %1117  ;;  %v3873_v61 = vpop.permute.xlu1 %1081 }
 0x1ed   : > { %4876 = vst [vmem:[#allocation47_spill] sm:$0xff] %v3873_v61  ;;  %1617 = vperm.xlu1 %3008, %v3649_v13   ;;  %4877 = vst [vmem:[#allocation48_spill] sm:$0xff] %v3892_v55 }
 0x1ee   : > { %1737 = vperm.xlu0 %3010, %v3643_v8  }
 0x1f0   : > { %v3877_v11 = vpop.permute.xlu0 %1133  ;;  %v3879_v5 = vpop.permute.xlu1 %1089 }
 0x1f1   : > { %1625 = vperm.xlu1 %3008, %v3657_v19  }
 0x1f2   : > { %1745 = vperm.xlu0 %3010, %v3649_v13  }
 0x1f4   : > { %v1098_v62 = vpop.permute.xlu1 %1097 }
 0x1f5   : > { %v3886_v40 = vpop.permute.xlu0 %1217  ;;  %1633 = vperm.xlu1 %3008, %v3665_v23   ;;  %v1174_v61 = vmul.f32 %v1151_v57, %v1098_v62  ;;  %v639_v62 = vcombine.high %v3892_v55, %v3892_v55 }
 0x1f6   : > { %1753 = vperm.xlu0 %3010, %v3657_v19  }
 0x1f7   : > { %v1190_v15 = vadd.f32 %v1174_v61, %v1062_v12  ;;  %v1039_v9 = vrot.slane %v639_v62, %v3775_v16  ;;  %v4800_v61 = vmov 7  }
 0x1f8   : > { %v3894_v47 = vpop.permute.xlu1 %1105 }
 0x1f9   : > { %v1226_v13 = vpop.permute.xlu0 %1225  ;;  %1641 = vperm.xlu1 %3008, %v3669_v24  }
 0x1fa   : > { %v1302_v17 = vmul.f32 %v3821_v10, %v1226_v13  ;;  %1761 = vperm.xlu0 %3010, %v3665_v23   ;;  %v3918_v10 = vrot.slane %v3739_v63, %v3552_v22  ;;  %v3931_v63 = vrot.slane %v3716_v44, %v3552_v22 }
 0x1fc   : > { %v3901_v57 = vadd.f32 %v1302_v17, %v1190_v15  ;;  %v3903_v19 = vpop.permute.xlu1 %1113  ;;  %v1167_v15 = vrot.slane %v639_v62, %v3780_v28  ;;  %4881 = vst [vmem:[#allocation52_spill] sm:$0xff] %v3931_v63  ;;  %v604_v58 = vcombine.high %v3931_v63, %v3931_v63 }
 0x1fd   : > { %v3905_v3 = vpop.permute.xlu0 %1233  ;;  %3009 = vset.pattern.permute.xlu1 %v3241_v60  ;;  %v1054_v60 = vmul.f32 %v1039_v9, %v1001_v20  ;;  %v606_v20 = vcombine.high %v3723_v52, %v3723_v52 }
 0x1fe   : > { %1769 = vperm.xlu0 %3010, %v3669_v24   ;;  %1713 = vperm.xlu1 %3009, %v3655_v18  }
 0x1ff   : > { %v1070_v24 = vadd.f32 %v3793_v42, %v1054_v60  ;;  %v589_v60 = vcombine.high %v3716_v44, %v3716_v44 }
 0x200   : > { %v3910_v12 = vpop.permute.xlu1 %1121 }
 0x201   : > { %4878 = vst [vmem:[#allocation49_spill] sm:$0xff] %v3910_v12  ;;  %v3912_v13 = vpop.permute.xlu0 %1241  ;;  %v3958_v44 = vrot.slane %v589_v60, %v3552_v22  ;;  %v3977_v60 = vrot.slane %v3823_v26, %v3780_v28 }
 0x202   : > { %4879 = vst [vmem:[#allocation50_spill] sm:$0xff] %v3912_v13  ;;  %3011 = vset.pattern.permute.xlu0 %v4800_v61  ;;  %1721 = vperm.xlu1 %3009, %v3663_v21   ;;  %v1295_v61 = vrot.slane %v3918_v10, %v3775_v16 }
 0x203   : > { %1841 = vperm.xlu0 %3011, %v3655_v18  }
 0x204   : > { %v1130_v17 = vpop.permute.xlu1 %1129 }
 0x205   : > { %v3922_v55 = vpop.permute.xlu0 %1249  ;;  %v1182_v23 = vmul.f32 %v1167_v15, %v1130_v17 }
 0x206   : > { %4880 = vst [vmem:[#allocation51_spill] sm:$0xff] %v3922_v55  ;;  %1725 = vperm.xlu1 %3009, %v3585_v41  }
 0x207   : > { %1853 = vperm.xlu0 %3011, %v3585_v41   ;;  %v1198_v17 = vadd.f32 %v1182_v23, %v1070_v24  ;;  %v620_v41 = vrot.slane %v606_v20, %v3552_v22  ;;  %v3954_v23 = vrot.slane %v3809_v56, %v3780_v28  ;;  %v1055_v24 = vmul.f32 %v1039_v9, %v3865_v49 }
 0x208   : > { %v3964_v20 = vrot.slane %v604_v58, %v3775_v16 }
 0x209   : > { %v1258_v62 = vpop.permute.xlu0 %1257  ;;  %v3935_v18 = vpop.permute.xlu1 %1201  ;;  %v622_v63 = vcombine.high %v620_v41, %v620_v41 }
 0x20a   : > { %4882 = vst [vmem:[#allocation53_spill] sm:$0xff] %v3935_v18  ;;  %v1310_v55 = vmul.f32 %v1295_v61, %v1258_v62  ;;  %1733 = vperm.xlu1 %3009, %v3563_v32   ;;  %v3967_v62 = vrot.slane %v604_v58, %v3780_v28  ;;  %v1051_v49 = vmul.f32 %v3964_v20, %v3861_v59 }
 0x20b   : > { %1861 = vperm.xlu0 %3011, %v3563_v32   ;;  %v494_v58 = vrot.slane %v3707_v29, %v3552_v22  ;;  %v1071_v32 = vadd.f32 %v3793_v42, %v1055_v24 }
 0x20c   : > { %v3939_v12 = vadd.f32 %v1310_v55, %v1198_v17  ;;  %v3961_v55 = vrot.slane %v620_v41, %v3775_v16 }
 0x20d   : > { %v3946_v52 = vpop.permute.xlu1 %1209 }
 0x20e   : > { %4883 = vst [vmem:[#allocation54_spill] sm:$0xff] %v3939_v12  ;;  %4884 = vst [vmem:[#allocation55_spill] sm:$0xff] %v3946_v52  ;;  %v3948_v13 = vpop.permute.xlu0 %1329  ;;  %1741 = vperm.xlu1 %3009, %v3593_v43   ;;  %v1183_v52 = vmul.f32 %v1167_v15, %v3877_v11  ;;  %v1053_v11 = vmul.f32 %v3961_v55, %v3803_v51  ;;  %v1179_v15 = vmul.f32 %v3967_v62, %v3871_v14 }
 0x20f   : > { %4885 = vst [vmem:[#allocation56_spill] sm:$0xff] %v3948_v13  ;;  %1869 = vperm.xlu0 %3011, %v3593_v43   ;;  %4886 = vst [vmem:[#allocation57_spill] sm:$0xff] %v3961_v55  ;;  %v3997_v13 = vrot.slane %v622_v63, %v3775_v16  ;;  %v1067_v14 = vadd.f32 %v3793_v42, %v1051_v49  ;;  %v4017_v49 = vrot.slane %v494_v58, %v3775_v16 }
 0x210   : > { %v1199_v24 = vadd.f32 %v1183_v52, %v1071_v32  ;;  %v1069_v52 = vadd.f32 %v3793_v42, %v1053_v11 }
 0x211   : > { %v1246_v17 = vpop.permute.xlu1 %1245 }
 0x212   : > { %v1358_v43 = vpop.permute.xlu0 %1357  ;;  %1749 = vperm.xlu1 %3009, %v3604_v48  }
 0x213   : > { %v1431_v9 = vmul.f32 %v3954_v23, %v1358_v43  ;;  %1877 = vperm.xlu0 %3011, %v3604_v48   ;;  %v3988_v43 = vrot.slane %v3958_v44, %v3775_v16  ;;  %v3994_v48 = vrot.slane %v620_v41, %v3780_v28  ;;  %v4006_v41 = vrot.slane %v3958_v44, %v3780_v28 }
 0x215   : > { %v3991_v59 = vadd.f32 %v1431_v9, %v3835_v38  ;;  %v1262_v26 = vpop.permute.xlu1 %1261  ;;  %v1307_v12 = vmul.f32 %v3988_v43, %v1246_v17  ;;  %v521_v38 = vcombine.high %v3719_v46, %v3719_v46  ;;  %v487_v17 = vcombine.high %v3707_v29, %v3707_v29 }
 0x216   : > { %v1311_v18 = vmul.f32 %v1295_v61, %v1262_v26  ;;  %v1366_v51 = vpop.permute.xlu0 %1365  ;;  %1757 = vperm.xlu1 %3009, %v3673_v25   ;;  %v1195_v61 = vadd.f32 %v1179_v15, %v1067_v14  ;;  %v502_v26 = vcombine.high %v494_v58, %v494_v58  ;;  %v1181_v11 = vmul.f32 %v3994_v48, %v3801_v50 }
 0x217   : > { %4887 = vst [vmem:[#allocation58_spill] sm:$0xff] %v3991_v59  ;;  %v1433_v55 = vmul.f32 %v3977_v60, %v1366_v51  ;;  %1885 = vperm.xlu0 %3011, %v3673_v25   ;;  %v535_v15 = vrot.slane %v521_v38, %v3552_v22  ;;  %v1041_v50 = vmul.f32 %v4017_v49, %v3737_v0 }
 0x218   : > { %v1327_v32 = vadd.f32 %v1311_v18, %v1199_v24  ;;  %v4023_v18 = vrot.slane %v622_v63, %v3780_v28  ;;  %v4033_v24 = vrot.slane %v494_v58, %v3780_v28  ;;  %v1197_v14 = vadd.f32 %v1181_v11, %v1069_v52 }
 0x219   : > { %v4012_v9 = vadd.f32 %v1433_v55, %v3840_v1  ;;  %v1309_v1 = vmul.f32 %v3997_v13, %v3843_v36  ;;  %v1323_v55 = vadd.f32 %v1307_v12, %v1195_v61  ;;  %v4038_v63 = vrot.slane %v487_v17, %v3552_v22 }
 0x21a   : > { %v1374_v51 = vpop.permute.xlu0 %1373  ;;  %1765 = vperm.xlu1 %3009, %v3614_v53   ;;  %v4020_v59 = vpop.permute.xlu1 %1337  ;;  %v4043_v36 = vrot.slane %v502_v26, %v3775_v16  ;;  %v537_v38 = vcombine.high %v535_v15, %v535_v15  ;;  %v4050_v52 = vrot.slane %v3918_v10, %v3780_v28  ;;  %v4053_v17 = vrot.slane %v535_v15, %v3775_v16 }
 0x21b   : > { %4888 = vst [vmem:[#allocation59_spill] sm:$0xff] %v4020_v59  ;;  %v1435_v29 = vmul.f32 %v4006_v41, %v1374_v51  ;;  %1893 = vperm.xlu0 %3011, %v3614_v53   ;;  %v1325_v51 = vadd.f32 %v1309_v1, %v1197_v14  ;;  %v1169_v0 = vmul.f32 %v4033_v24, %v3743_v2 }
 0x21c   : > { %v4058_v11 = vrot.slane %v502_v26, %v3780_v28  ;;  %v1297_v14 = vmul.f32 %v4043_v36, %v3751_v6  ;;  %v1044_v2 = vmul.f32 %v4053_v17, %v3828_v45  ;;  %v4889_v26 = vmov 7  }
 0x21d   : > { %v4035_v46 = vadd.f32 %v1435_v29, %v1323_v55  ;;  %v4061_v55 = vrot.slane %v535_v15, %v3780_v28  ;;  %v1057_v29 = vadd.f32 %v3793_v42, %v1041_v50  ;;  %v4076_v15 = vrot.slane %v537_v38, %v3775_v16 }
 0x21e   : > { %v1382_v12 = vpop.permute.xlu0 %1381  ;;  %1773 = vperm.xlu1 %3009, %v3679_v27   ;;  %v1346_v61 = vpop.permute.xlu1 %1345  ;;  %v1425_v6 = vmul.f32 %v4058_v11, %v3756_v7 }
 0x21f   : > { %v1437_v58 = vmul.f32 %v4023_v18, %v1382_v12  ;;  %1901 = vperm.xlu0 %3011, %v3679_v27   ;;  %v4070_v12 = vrot.slane %v3725_v54, %v3552_v22  ;;  %v1185_v54 = vadd.f32 %v1169_v0, %v1057_v29  ;;  %v1172_v45 = vmul.f32 %v4061_v55, %v3879_v5 }
 0x220   : > { %v1060_v0 = vadd.f32 %v3793_v42, %v1044_v2  ;;  %v1300_v7 = vmul.f32 %v4076_v15, %v3886_v40  ;;  %v572_v29 = vcombine.high %v3710_v35, %v3710_v35  ;;  %v1048_v35 = vmul.f32 %v3783_v30, %v3845_v33 }
 0x221   : > { %v4063_v1 = vadd.f32 %v1437_v58, %v1325_v51  ;;  %v4822_v58 = vmov 8   ;;  %v4132_v33 = vrot.slane %v3713_v37, %v3552_v22 }
 0x222   : > { %v1390_v53 = vpop.permute.xlu0 %1389  ;;  %3012 = vset.pattern.permute.xlu1 %v4889_v26  ;;  %v1354_v59 = vpop.permute.xlu1 %1353  ;;  %v4089_v26 = vrot.slane %v4038_v63, %v3775_v16 }
 0x223   : > { %v1439_v51 = vmul.f32 %v4050_v52, %v1390_v53  ;;  %v1430_v50 = vmul.f32 %v3954_v23, %v1354_v59  ;;  %3014 = vset.pattern.permute.xlu0 %v4822_v58  ;;  %1845 = vperm.xlu1 %3012, %v3560_v31   ;;  %v1313_v59 = vadd.f32 %v1297_v14, %v1185_v54 }
 0x224   : > { %1973 = vperm.xlu0 %3014, %v3560_v31   ;;  %v4095_v58 = vrot.slane %v537_v38, %v3780_v28  ;;  %v1188_v14 = vadd.f32 %v1172_v45, %v1060_v0  ;;  %4891 = vst [vmem:[#allocation61_spill] sm:$0xff] %v4132_v33  ;;  %v1050_v45 = vmul.f32 %v3964_v20, %v3849_v39 }
 0x225   : > { %v4091_v53 = vadd.f32 %v1439_v51, %v1327_v32  ;;  %v1446_v23 = vadd.f32 %v1430_v50, %v3901_v57  ;;  %v4105_v32 = vrot.slane %v4070_v12, %v3775_v16  ;;  %v4109_v57 = vcombine.high %v3809_v56, %v3809_v56 }
 0x226   : > { %v1362_v5 = vpop.permute.xlu1 %1361  ;;  %v1441_v38 = vadd.f32 %v1425_v6, %v1313_v59  ;;  %v1428_v2 = vmul.f32 %v4095_v58, %v1346_v61  ;;  %v1316_v51 = vadd.f32 %v1300_v7, %v1188_v14  ;;  %v1176_v61 = vmul.f32 %v3790_v34, %v3894_v47  ;;  %v4892_v34 = vld [vmem:[#allocation42_spill] sm:$0xff] }
 0x227   : > { %4890 = vst [vmem:[#allocation60_spill] sm:$0xff] %v4091_v53  ;;  %v1462_v27 = vpop.permute.xlu0 %1461  ;;  %1849 = vperm.xlu1 %3012, %v3663_v21   ;;  %v4119_v53 = vrot.slane %v572_v29, %v3552_v22  ;;  %v4128_v30 = vrot.slane %v4109_v57, %v3775_v16  ;;  %v1064_v59 = vadd.f32 %v3793_v42, %v1048_v35  ;;  %v4894_v35 = vld [vmem:[#allocation44_spill] sm:$0xff] }
 0x228   : > { %v1553_v40 = vmul.f32 %v4089_v26, %v1462_v27  ;;  %1985 = vperm.xlu0 %3014, %v3637_v4   ;;  %v1444_v6 = vadd.f32 %v1428_v2, %v1316_v51  ;;  %v1304_v47 = vmul.f32 %v4892_v34, %v3905_v3  ;;  %v1178_v29 = vmul.f32 %v3967_v62, %v3903_v19  ;;  %v4895_v51 = vld [vmem:[#allocation57_spill] sm:$0xff] }
 0x229   : > { %v4146_v14 = vcombine.high %v3958_v44, %v3958_v44  ;;  %v1192_v2 = vadd.f32 %v1176_v61, %v1064_v59  ;;  %v1432_v39 = vmul.f32 %v3977_v60, %v1362_v5  ;;  %v4153_v3 = vrot.slane %v4119_v53, %v3775_v16  ;;  %v4896_v5 = vld [vmem:[#allocation50_spill] sm:$0xff] }
 0x22a   : > { %v4116_v50 = vadd.f32 %v1553_v40, %v1441_v38  ;;  %v1370_v54 = vpop.permute.xlu1 %1369  ;;  %v4893_v40 = vld [vmem:[#allocation22_spill] sm:$0xff]  ;;  %v504_v19 = vcombine.high %v3713_v37, %v3713_v37  ;;  %v519_v62 = vcombine.high %v4132_v33, %v4132_v33  ;;  %v1066_v44 = vadd.f32 %v3793_v42, %v1050_v45 }
 0x22b   : > { %v1474_v56 = vpop.permute.xlu0 %1473  ;;  %1857 = vperm.xlu1 %3012, %v3637_v4   ;;  %v1320_v60 = vadd.f32 %v1304_v47, %v1192_v2  ;;  %v1306_v61 = vmul.f32 %v3988_v43, %v4896_v5  ;;  %v4898_v59 = vld [vmem:[#allocation30_spill] sm:$0xff]  ;;  %v4174_v45 = vrot.slane %v4146_v14, %v3775_v16  ;;  %v4899_v47 = vld [vmem:[#allocation49_spill] sm:$0xff]  ;;  %v1434_v2 = vmul.f32 %v4006_v41, %v1370_v54 }
 0x22c   : > { %v1556_v27 = vmul.f32 %v4105_v32, %v1474_v56  ;;  %1993 = vperm.xlu0 %3014, %v3643_v8   ;;  %v1052_v56 = vmul.f32 %v4895_v51, %v4894_v35  ;;  %v4168_v34 = vrot.slane %v4898_v59, %v3552_v22  ;;  %v1194_v37 = vadd.f32 %v1178_v29, %v1066_v44  ;;  %v4900_v35 = vld [vmem:[#allocation24_spill] sm:$0xff] }
 0x22d   : > { %v1180_v43 = vmul.f32 %v3994_v48, %v4899_v47  ;;  %v4182_v29 = vrot.slane %v519_v62, %v3775_v16  ;;  %v518_v48 = vrot.slane %v504_v19, %v3552_v22  ;;  %v4905_v19 = vld [vmem:[#allocation38_spill] sm:$0xff]  ;;  %v4906_v47 = vld [vmem:[#allocation43_spill] sm:$0xff] }
 0x22e   : > { %v4139_v0 = vadd.f32 %v1556_v27, %v1444_v6  ;;  %v1378_v7 = vpop.permute.xlu1 %1377  ;;  %v1068_v51 = vadd.f32 %v3793_v42, %v1052_v56  ;;  %v1322_v5 = vadd.f32 %v1306_v61, %v1194_v37  ;;  %v4904_v37 = vld [vmem:[#allocation26_spill] sm:$0xff] }
 0x22f   : > { %v1482_v38 = vpop.permute.xlu0 %1481  ;;  %1865 = vperm.xlu1 %3012, %v3643_v8  }
 0x230   : > { %v1558_v20 = vmul.f32 %v4128_v30, %v1482_v38  ;;  %2001 = vperm.xlu0 %3014, %v4893_v40   ;;  %v1196_v56 = vadd.f32 %v1180_v43, %v1068_v51  ;;  %v4212_v43 = vrot.slane %v519_v62, %v3780_v28 }
 0x232   : > { %v4164_v6 = vadd.f32 %v1558_v20, %v1446_v23  ;;  %v1386_v27 = vpop.permute.xlu1 %1385  ;;  %v1448_v23 = vadd.f32 %v1432_v39, %v1320_v60  ;;  %v4198_v39 = vcombine.high %v3918_v10, %v3918_v10  ;;  %v1450_v60 = vadd.f32 %v1434_v2, %v1322_v5  ;;  %v4910_v5 = vld [vmem:[#allocation25_spill] sm:$0xff] }
 0x233   : > { %v1438_v38 = vmul.f32 %v4050_v52, %v1386_v27  ;;  %v1490_v33 = vpop.permute.xlu0 %1489  ;;  %1873 = vperm.xlu1 %3012, %v4893_v40   ;;  %v4901_v52 = vld [vmem:[#allocation54_spill] sm:$0xff]  ;;  %v4902_v27 = vld [vmem:[#allocation51_spill] sm:$0xff] }
 0x234   : > { %4897 = vst [vmem:[#allocation42_spill] sm:$0xff] %v4164_v6  ;;  %v1560_v20 = vmul.f32 %v4153_v3, %v1490_v33  ;;  %2009 = vperm.xlu0 %3014, %v4900_v35   ;;  %v1308_v59 = vmul.f32 %v3997_v13, %v4902_v27  ;;  %v4194_v33 = vrot.slane %v4168_v34, %v3775_v16 }
 0x235   : > { %v1454_v44 = vadd.f32 %v1438_v38, %v4901_v52  ;;  %v1436_v13 = vmul.f32 %v4023_v18, %v1378_v7  ;;  %v1043_v38 = vmul.f32 %v4182_v29, %v4905_v19  ;;  %v4215_v18 = vrot.slane %v518_v48, %v3775_v16  ;;  %v4909_v7 = vld [vmem:[#allocation46_spill] sm:$0xff] }
 0x236   : > { %v4188_v6 = vadd.f32 %v1560_v20, %v1448_v23  ;;  %v1040_v23 = vmul.f32 %v4017_v49, %v4906_v47  ;;  %v4907_v20 = vld [vmem:[#allocation32_spill] sm:$0xff]  ;;  %v1324_v27 = vadd.f32 %v1308_v59, %v1196_v56  ;;  %v1168_v2 = vmul.f32 %v4033_v24, %v4909_v7  ;;  %v4911_v49 = vld [vmem:[#allocation34_spill] sm:$0xff]  ;;  %v4914_v7 = vld [vmem:[#allocation37_spill] sm:$0xff] }
 0x237   : > { %v1498_v41 = vpop.permute.xlu0 %1497  ;;  %1881 = vperm.xlu1 %3012, %v4900_v35   ;;  %v1458_v54 = vpop.permute.xlu1 %1457  ;;  %v1045_v52 = vmul.f32 %v4053_v17, %v4907_v20  ;;  %v1173_v17 = vmul.f32 %v4061_v55, %v4911_v49  ;;  %v4228_v62 = vrot.slane %v4198_v39, %v3775_v16  ;;  %v4913_v20 = vld [vmem:[#allocation35_spill] sm:$0xff]  ;;  %v4915_v49 = vld [vmem:[#allocation41_spill] sm:$0xff] }
 0x238   : > { %4903 = vst [vmem:[#allocation22_spill] sm:$0xff] %v4188_v6  ;;  %v1562_v61 = vmul.f32 %v4174_v45, %v1498_v41  ;;  %2025 = vperm.xlu0 %3014, %v4904_v37   ;;  %v1452_v59 = vadd.f32 %v1436_v13, %v1324_v27  ;;  %v1056_v24 = vadd.f32 %v3793_v42, %v1040_v23  ;;  %v4916_v6 = vld [vmem:[#allocation56_spill] sm:$0xff] }
 0x239   : > { %v1061_v47 = vadd.f32 %v3793_v42, %v1045_v52  ;;  %v1301_v55 = vmul.f32 %v4076_v15, %v4913_v20  ;;  %v520_v27 = vcombine.high %v518_v48, %v518_v48  ;;  %v1424_v23 = vmul.f32 %v4058_v11, %v4916_v6 }
 0x23a   : > { %v4209_v10 = vadd.f32 %v1562_v61, %v1450_v60  ;;  %v1059_v60 = vadd.f32 %v3793_v42, %v1043_v38  ;;  %v4912_v61 = vld [vmem:[#allocation53_spill] sm:$0xff]  ;;  %v1184_v38 = vadd.f32 %v1168_v2, %v1056_v24  ;;  %v3244_v20 = vmov 9  }
 0x23b   : > { %v1506_v51 = vpop.permute.xlu0 %1505  ;;  %1889 = vperm.xlu1 %3012, %v4910_v5   ;;  %v4220_v41 = vpop.permute.xlu1 %1465  ;;  %v1296_v19 = vmul.f32 %v4043_v36, %v4912_v61  ;;  %v1189_v52 = vadd.f32 %v1173_v17, %v1061_v47  ;;  %v4917_v61 = vld [vmem:[#allocation36_spill] sm:$0xff]  ;;  %v1552_v11 = vmul.f32 %v4089_v26, %v1458_v54  ;;  %v4257_v6 = vrot.slane %v4038_v63, %v3780_v28 }
 0x23c   : > { %4908 = vst [vmem:[#allocation44_spill] sm:$0xff] %v4209_v10  ;;  %v1564_v56 = vmul.f32 %v4194_v33, %v1506_v51  ;;  %2013 = vperm.xlu0 %3014, %v3673_v25   ;;  %v1171_v51 = vmul.f32 %v4212_v43, %v4914_v7  ;;  %v1299_v10 = vmul.f32 %v4215_v18, %v4915_v49  ;;  %v4918_v7 = vmov 8  }
 0x23d   : > { %v1429_v15 = vmul.f32 %v4095_v58, %v4917_v61  ;;  %v1312_v24 = vadd.f32 %v1296_v19, %v1184_v38  ;;  %v1317_v17 = vadd.f32 %v1301_v55, %v1189_v52  ;;  %v4268_v49 = vrot.slane %v520_v27, %v3780_v28  ;;  %v4920_v55 = vld [vmem:[#allocation40_spill] sm:$0xff] }
 0x23e   : > { %v4237_v13 = vadd.f32 %v1564_v56, %v1452_v59  ;;  %v4249_v59 = vrot.slane %v518_v48, %v3780_v28  ;;  %v1187_v2 = vadd.f32 %v1171_v51, %v1059_v60  ;;  %v4919_v51 = vld [vmem:[#allocation23_spill] sm:$0xff] }
 0x23f   : > { %v1514_v35 = vpop.permute.xlu0 %1513  ;;  %1897 = vperm.xlu1 %3012, %v4904_v37   ;;  %v1470_v36 = vpop.permute.xlu1 %1469  ;;  %v1440_v47 = vadd.f32 %v1424_v23, %v1312_v24  ;;  %v1445_v19 = vadd.f32 %v1429_v15, %v1317_v17 }
 0x240   : > { %v1566_v56 = vmul.f32 %v4228_v62, %v1514_v35  ;;  %3016 = vset.pattern.permute.xlu0 %v3244_v20  ;;  %v1315_v48 = vadd.f32 %v1299_v10, %v1187_v2  ;;  %v4262_v35 = vrot.slane %v520_v27, %v3775_v16 }
 0x241   : > { %2105 = vperm.xlu0 %3016, %v3663_v21   ;;  %v1568_v10 = vadd.f32 %v1552_v11, %v1440_v47 }
 0x242   : > { %v4259_v58 = vadd.f32 %v1566_v56, %v1454_v44  ;;  %v1427_v44 = vmul.f32 %v4249_v59, %v4920_v55  ;;  %v1555_v38 = vmul.f32 %v4262_v35, %v1470_v36  ;;  %v4283_v36 = vrot.slane %v4070_v12, %v3780_v28 }
 0x243   : > { %3013 = vset.pattern.permute.xlu1 %v4918_v7  ;;  %v1478_v60 = vpop.permute.xlu1 %1477 }
 0x244   : > { %v1557_v26 = vmul.f32 %v4105_v32, %v1478_v60  ;;  %v1586_v54 = vpop.permute.xlu0 %1585  ;;  %1969 = vperm.xlu1 %3013, %v4919_v51   ;;  %v1443_v61 = vadd.f32 %v1427_v44, %v1315_v48  ;;  %v4922_v60 = vld [vmem:[#allocation18_spill] sm:$0xff] }
 0x245   : > { %v1680_v23 = vmul.f32 %v4257_v6, %v1586_v54  ;;  %2129 = vperm.xlu0 %3016, %v4893_v40   ;;  %v4921_v40 = vld [vmem:[#allocation58_spill] sm:$0xff] }
 0x246   : > { %v1573_v52 = vadd.f32 %v1557_v26, %v1445_v19  ;;  %v1571_v27 = vadd.f32 %v1555_v38, %v1443_v61  ;;  %v4294_v19 = vrot.slane %v4109_v57, %v3780_v28 }
 0x247   : > { %v4275_v15 = vadd.f32 %v1680_v23, %v1568_v10  ;;  %v1486_v32 = vpop.permute.xlu1 %1485  ;;  %v4924_v23 = vld [vmem:[#allocation19_spill] sm:$0xff] }
 0x248   : > { %v1559_v56 = vmul.f32 %v4128_v30, %v1486_v32  ;;  %v1598_v2 = vpop.permute.xlu0 %1597  ;;  %1977 = vperm.xlu1 %3013, %v3663_v21  }
 0x249   : > { %v1683_v24 = vmul.f32 %v4268_v49, %v1598_v2  ;;  %2145 = vperm.xlu0 %3016, %v4910_v5  }
 0x24a   : > { %v1575_v11 = vadd.f32 %v1559_v56, %v4921_v40 }
 0x24b   : > { %v4286_v17 = vadd.f32 %v1683_v24, %v1571_v27  ;;  %v1494_v48 = vpop.permute.xlu1 %1493  ;;  %v4318_v27 = vrot.slane %v4146_v14, %v3780_v28  ;;  %v4926_v24 = vld [vmem:[#allocation47_spill] sm:$0xff] }
 0x24c   : > { %v1561_v47 = vmul.f32 %v4153_v3, %v1494_v48  ;;  %v1606_v30 = vpop.permute.xlu0 %1605  ;;  %1981 = vperm.xlu1 %3013, %v4922_v60   ;;  %v4923_v3 = vld [vmem:[#allocation17_spill] sm:$0xff]  ;;  %v1170_v40 = vmul.f32 %v4212_v43, %v4926_v24  ;;  %v4930_v43 = vld [vmem:[#allocation60_spill] sm:$0xff] }
 0x24d   : > { %v1685_v21 = vmul.f32 %v4283_v36, %v1606_v30  ;;  %2101 = vperm.xlu0 %3016, %v3560_v31   ;;  %v4305_v31 = vrot.slane %v4119_v53, %v3780_v28 }
 0x24e   : > { %v1577_v26 = vadd.f32 %v1561_v47, %v4012_v9 }
 0x24f   : > { %v4297_v54 = vadd.f32 %v1685_v21, %v1573_v52  ;;  %v1502_v55 = vpop.permute.xlu1 %1501 }
 0x250   : > { %v1563_v44 = vmul.f32 %v4174_v45, %v1502_v55  ;;  %v1614_v10 = vpop.permute.xlu0 %1613  ;;  %1989 = vperm.xlu1 %3013, %v4923_v3   ;;  %v4925_v45 = vld [vmem:[#allocation45_spill] sm:$0xff]  ;;  %v4929_v55 = vld [vmem:[#allocation27_spill] sm:$0xff] }
 0x251   : > { %v1687_v38 = vmul.f32 %v4294_v19, %v1614_v10  ;;  %2125 = vperm.xlu0 %3016, %v4924_v23   ;;  %v1042_v56 = vmul.f32 %v4182_v29, %v4925_v45  ;;  %v4927_v29 = vld [vmem:[#allocation20_spill] sm:$0xff] }
 0x252   : > { %v1579_v57 = vadd.f32 %v1563_v44, %v4035_v46 }
 0x253   : > { %v4308_v61 = vadd.f32 %v1687_v38, %v1575_v11  ;;  %v1510_v9 = vpop.permute.xlu1 %1509  ;;  %v1058_v30 = vadd.f32 %v3793_v42, %v1042_v56 }
 0x254   : > { %v1565_v52 = vmul.f32 %v4194_v33, %v1510_v9  ;;  %v1622_v32 = vpop.permute.xlu0 %1621  ;;  %1997 = vperm.xlu1 %3013, %v4924_v23   ;;  %v4344_v23 = vrot.slane %v4198_v39, %v3780_v28 }
 0x255   : > { %v1689_v2 = vmul.f32 %v4305_v31, %v1622_v32  ;;  %2141 = vperm.xlu0 %3016, %v3673_v25   ;;  %v4928_v25 = vld [vmem:[#allocation55_spill] sm:$0xff]  ;;  %v1186_v44 = vadd.f32 %v1170_v40, %v1058_v30 }
 0x256   : > { %v1581_v46 = vadd.f32 %v1565_v52, %v4063_v1  ;;  %v1298_v21 = vmul.f32 %v4215_v18, %v4928_v25  ;;  %v4334_v1 = vrot.slane %v4168_v34, %v3780_v28  ;;  %v1554_v52 = vmul.f32 %v4262_v35, %v4220_v41 }
 0x257   : > { %v4323_v33 = vadd.f32 %v1689_v2, %v1577_v26  ;;  %v1518_v11 = vpop.permute.xlu1 %1517 }
 0x258   : > { %v1567_v48 = vmul.f32 %v4228_v62, %v1518_v11  ;;  %v1630_v47 = vpop.permute.xlu0 %1629  ;;  %2005 = vperm.xlu1 %3013, %v4927_v29   ;;  %v4931_v62 = vld [vmem:[#allocation59_spill] sm:$0xff]  ;;  %v1314_v9 = vadd.f32 %v1298_v21, %v1186_v44  ;;  %v4397_v44 = vcombine.high %v4119_v53, %v4119_v53 }
 0x259   : > { %v1691_v14 = vmul.f32 %v4318_v27, %v1630_v47  ;;  %2157 = vperm.xlu0 %3016, %v4929_v55   ;;  %v1426_v10 = vmul.f32 %v4249_v59, %v4931_v62  ;;  %v4352_v59 = vcombine.high %v4038_v63, %v4038_v63  ;;  %v4933_v62 = vld [vmem:[#allocation42_spill] sm:$0xff] }
 0x25a   : > { %v1583_v26 = vadd.f32 %v1567_v48, %v4930_v43  ;;  %v4411_v53 = vrot.slane %v4397_v44, %v3775_v16 }
 0x25b   : > { %v4339_v38 = vadd.f32 %v1691_v14, %v1579_v57  ;;  %v1442_v57 = vadd.f32 %v1426_v10, %v1314_v9  ;;  %v4934_v9 = vld [vmem:[#allocation24_spill] sm:$0xff] }
 0x25c   : > { %v1638_v42 = vpop.permute.xlu0 %1637  ;;  %2017 = vperm.xlu1 %3013, %v4910_v5   ;;  %v1590_v18 = vpop.permute.xlu1 %1589 }
 0x25d   : > { %v1693_v32 = vmul.f32 %v4334_v1, %v1638_v42  ;;  %v1681_v45 = vmul.f32 %v4257_v6, %v1590_v18  ;;  %v1570_v24 = vadd.f32 %v1554_v52, %v1442_v57  ;;  %v4932_v6 = vld [vmem:[#allocation31_spill] sm:$0xff] }
 0x25e   : > { %v555_v63 = vcombine.high %v4932_v6, %v4932_v6 }
 0x25f   : > { %v4354_v56 = vadd.f32 %v1693_v32, %v1581_v46  ;;  %v1697_v5 = vadd.f32 %v1681_v45, %v4116_v50  ;;  %v4365_v46 = vrot.slane %v4352_v59, %v3775_v16  ;;  %v4369_v50 = vcombine.high %v4070_v12, %v4070_v12  ;;  %v4936_v45 = vld [vmem:[#allocation22_spill] sm:$0xff] }
 0x260   : > { %v1646_v2 = vpop.permute.xlu0 %1645  ;;  %3015 = vset.pattern.permute.xlu1 %v3244_v20  ;;  %v1594_v39 = vpop.permute.xlu1 %1593 }
 0x261   : > { %v1695_v41 = vmul.f32 %v4344_v23, %v1646_v2  ;;  %v1682_v35 = vmul.f32 %v4268_v49, %v1594_v39  ;;  %2097 = vperm.xlu1 %3015, %v4919_v51   ;;  %v4378_v51 = vrot.slane %v555_v63, %v3552_v22  ;;  %v4383_v25 = vrot.slane %v4369_v50, %v3775_v16 }
 0x262   : > { %v4427_v63 = vcombine.high %v4168_v34, %v4168_v34 }
 0x263   : > { %v4371_v40 = vadd.f32 %v1695_v41, %v1583_v26  ;;  %v4373_v11 = vadd.f32 %v1682_v35, %v1570_v24  ;;  %v4393_v26 = vrot.slane %v4378_v51, %v3775_v16  ;;  %v4937_v24 = vld [vmem:[#allocation33_spill] sm:$0xff] }
 0x264   : > { %v1602_v48 = vpop.permute.xlu1 %1601  ;;  %v640_v41 = vcombine.high %v4937_v24, %v4937_v24  ;;  %v4441_v34 = vrot.slane %v4427_v63, %v3775_v16 }
 0x265   : > { %v1684_v49 = vmul.f32 %v4283_v36, %v1602_v48  ;;  %v1718_v47 = vpop.permute.xlu0 %1717  ;;  %2113 = vperm.xlu1 %3015, %v3637_v4   ;;  %v4938_v48 = vld [vmem:[#allocation44_spill] sm:$0xff] }
 0x266   : > { %v1809_v30 = vmul.f32 %v4365_v46, %v1718_v47 }
 0x267   : > { %v1700_v12 = vadd.f32 %v1684_v49, %v4139_v0 }
 0x268   : > { %v4386_v21 = vadd.f32 %v1809_v30, %v1697_v5  ;;  %v1610_v14 = vpop.permute.xlu1 %1609 }
 0x269   : > { %v1686_v43 = vmul.f32 %v4294_v19, %v1610_v14  ;;  %v1730_v36 = vpop.permute.xlu0 %1729  ;;  %2121 = vperm.xlu1 %3015, %v3643_v8   ;;  %v4935_v8 = vld [vmem:[#allocation29_spill] sm:$0xff] }
 0x26a   : > { %v1812_v4 = vmul.f32 %v4383_v25, %v1730_v36  ;;  %v4406_v52 = vrot.slane %v4935_v8, %v3552_v22 }
 0x26b   : > { %v1702_v0 = vadd.f32 %v1686_v43, %v4933_v62  ;;  %v4939_v43 = vld [vmem:[#allocation21_spill] sm:$0xff] }
 0x26c   : > { %v4400_v10 = vadd.f32 %v1812_v4, %v1700_v12  ;;  %v1618_v42 = vpop.permute.xlu1 %1617  ;;  %v4423_v6 = vrot.slane %v4406_v52, %v3775_v16  ;;  %v4435_v12 = vrot.slane %v640_v41, %v3552_v22 }
 0x26d   : > { %v1688_v19 = vmul.f32 %v4305_v31, %v1618_v42  ;;  %v1738_v18 = vpop.permute.xlu0 %1737  ;;  %2137 = vperm.xlu1 %3015, %v4934_v9  }
 0x26e   : > { %v1814_v32 = vmul.f32 %v4393_v26, %v1738_v18  ;;  %v4455_v18 = vrot.slane %v4435_v12, %v3775_v16 }
 0x26f   : > { %v1704_v57 = vadd.f32 %v1688_v19, %v4936_v45 }
 0x270   : > { %v4414_v5 = vadd.f32 %v1814_v32, %v1702_v0  ;;  %v1626_v2 = vpop.permute.xlu1 %1625 }
 0x271   : > { %v1690_v31 = vmul.f32 %v4318_v27, %v1626_v2  ;;  %v1746_v39 = vpop.permute.xlu0 %1745  ;;  %2153 = vperm.xlu1 %3015, %v4904_v37  }
 0x272   : > { %v1816_v35 = vmul.f32 %v4411_v53, %v1746_v39 }
 0x273   : > { %v1706_v49 = vadd.f32 %v1690_v31, %v4938_v48 }
 0x274   : > { %v4430_v47 = vadd.f32 %v1816_v35, %v1704_v57  ;;  %v1634_v27 = vpop.permute.xlu1 %1633 }
 0x275   : > { %v1692_v37 = vmul.f32 %v4334_v1, %v1634_v27  ;;  %v1754_v30 = vpop.permute.xlu0 %1753  ;;  %3017 = vset.pattern.permute.xlu1 %v4918_v7  ;;  %v4940_v7 = vld [vmem:[#allocation28_spill] sm:$0xff] }
 0x276   : > { %v1818_v14 = vmul.f32 %v4423_v6, %v1754_v30  ;;  %2021 = vperm.xlu1 %3017, %v4939_v43   ;;  %v4449_v42 = vrot.slane %v4940_v7, %v3552_v22  ;;  %v1923_v7 = vrot.slane %v4397_v44, %v3780_v28 }
 0x277   : > { %v1708_v36 = vadd.f32 %v1692_v37, %v4237_v13 }
 0x278   : > { %v4444_v4 = vadd.f32 %v1818_v14, %v1706_v49  ;;  %v1642_v62 = vpop.permute.xlu1 %1641  ;;  %v1783_v57 = vrot.slane %v4449_v42, %v3775_v16 }
 0x279   : > { %v1694_v1 = vmul.f32 %v4344_v23, %v1642_v62  ;;  %v1762_v0 = vpop.permute.xlu0 %1761 }
 0x27a   : > { %v1820_v19 = vmul.f32 %v4441_v34, %v1762_v0  ;;  %2029 = vperm.xlu1 %3017, %v4929_v55   ;;  %v4468_v55 = vrot.slane %v4352_v59, %v3780_v28 }
 0x27b   : > { %v1710_v13 = vadd.f32 %v1694_v1, %v4259_v58 }
 0x27c   : > { %v4458_v9 = vadd.f32 %v1820_v19, %v1708_v36  ;;  %v1919_v36 = vrot.slane %v4378_v51, %v3780_v28 }
 0x27d   : > { %v1770_v8 = vpop.permute.xlu0 %1769  ;;  %v1714_v32 = vpop.permute.xlu1 %1713 }
 0x27e   : > { %v1822_v23 = vmul.f32 %v4455_v18, %v1770_v8  ;;  %v1808_v45 = vmul.f32 %v4365_v46, %v1714_v32  ;;  %3018 = vset.pattern.permute.xlu1 %v3244_v20  ;;  %v1911_v20 = vrot.slane %v4449_v42, %v3780_v28 }
 0x27f   : > { %2109 = vperm.xlu1 %3018, %v4922_v60  }
 0x280   : > { %v4470_v58 = vadd.f32 %v1822_v23, %v1710_v13  ;;  %v1824_v2 = vadd.f32 %v1808_v45, %v4275_v15  ;;  %v1915_v15 = vrot.slane %v4369_v50, %v3780_v28 }
 0x281   : > { %v1722_v31 = vpop.permute.xlu1 %1721 }
 0x282   : > { %v1810_v39 = vmul.f32 %v1783_v57, %v1722_v31  ;;  %v1842_v24 = vpop.permute.xlu0 %1841 }
 0x283   : > { %v1936_v46 = vmul.f32 %v4468_v55, %v1842_v24  ;;  %2117 = vperm.xlu1 %3018, %v4923_v3  }
 0x284   : > { %v4478_v60 = vadd.f32 %v1810_v39, %v4373_v11 }
 0x285   : > { %v4480_v41 = vadd.f32 %v1936_v46, %v1824_v2  ;;  %v1726_v59 = vpop.permute.xlu1 %1725 }
 0x286   : > { %v1811_v35 = vmul.f32 %v1783_v57, %v1726_v59  ;;  %v1854_v48 = vpop.permute.xlu0 %1853 }
 0x287   : > { %v1939_v49 = vmul.f32 %v1911_v20, %v1854_v48  ;;  %2133 = vperm.xlu1 %3018, %v4927_v29  }
 0x288   : > { %v1827_v27 = vadd.f32 %v1811_v35, %v4286_v17 }
 0x289   : > { %v1734_v3 = vpop.permute.xlu1 %1733 }
 0x28a   : > { %v4486_v37 = vadd.f32 %v1939_v49, %v1827_v27  ;;  %v1813_v30 = vmul.f32 %v4383_v25, %v1734_v3  ;;  %v1862_v11 = vpop.permute.xlu0 %1861  ;;  %v4941_v3 = vld [vmem:[#allocation61_spill] sm:$0xff] }
 0x28b   : > { %v1941_v14 = vmul.f32 %v1915_v15, %v1862_v11  ;;  %2149 = vperm.xlu1 %3018, %v4939_v43  }
 0x28c   : > { %v1829_v62 = vadd.f32 %v1813_v30, %v4297_v54  ;;  %v1927_v54 = vrot.slane %v4406_v52, %v3780_v28  ;;  %v2035_v30 = vrot.slane %v4941_v3, %v3775_v16 }
 0x28d   : > { %v1742_v29 = vpop.permute.xlu1 %1741 }
 0x28e   : > { %v4493_v1 = vadd.f32 %v1941_v14, %v1829_v62  ;;  %v1815_v50 = vmul.f32 %v4393_v26, %v1742_v29  ;;  %v1870_v17 = vpop.permute.xlu0 %1869 }
 0x28f   : > { %v1943_v0 = vmul.f32 %v1919_v36, %v1870_v17 }
 0x290   : > { %v1831_v25 = vadd.f32 %v1815_v50, %v4308_v61  ;;  %v1931_v61 = vrot.slane %v4427_v63, %v3780_v28 }
 0x291   : > { %v1750_v19 = vpop.permute.xlu1 %1749 }
 0x292   : > { %v4499_v13 = vadd.f32 %v1943_v0, %v1831_v25  ;;  %v1817_v43 = vmul.f32 %v4411_v53, %v1750_v19  ;;  %v1878_v8 = vpop.permute.xlu0 %1877 }
 0x293   : > { %v1945_v32 = vmul.f32 %v1923_v7, %v1878_v8 }
 0x294   : > { %v1833_v23 = vadd.f32 %v1817_v43, %v4323_v33  ;;  %v1935_v33 = vrot.slane %v4435_v12, %v3780_v28 }
 0x295   : > { %v1758_v26 = vpop.permute.xlu1 %1757 }
 0x296   : > { %v4505_v45 = vadd.f32 %v1945_v32, %v1833_v23  ;;  %v1819_v57 = vmul.f32 %v4423_v6, %v1758_v26  ;;  %v1886_v44 = vpop.permute.xlu0 %1885 }
 0x297   : > { %v1947_v2 = vmul.f32 %v1927_v54, %v1886_v44 }
 0x298   : > { %v1835_v31 = vadd.f32 %v1819_v57, %v4339_v38 }
 0x299   : > { %v1766_v53 = vpop.permute.xlu1 %1765 }
 0x29a   : > { %v1963_v39 = vadd.f32 %v1947_v2, %v1835_v31  ;;  %v1821_v24 = vmul.f32 %v4441_v34, %v1766_v53  ;;  %v1894_v46 = vpop.permute.xlu0 %1893 }
 0x29b   : > { %v1949_v59 = vmul.f32 %v1931_v61, %v1894_v46 }
 0x29c   : > { %v1837_v35 = vadd.f32 %v1821_v24, %v4354_v56  ;;  %v4942_v56 = vld [vmem:[#allocation39_spill] sm:$0xff] }
 0x29d   : > { %v1774_v48 = vpop.permute.xlu1 %1773  ;;  %v4526_v50 = vrot.slane %v4942_v56, %v3775_v16 }
 0x29e   : > { %v4515_v6 = vadd.f32 %v1949_v59, %v1837_v35  ;;  %v1823_v49 = vmul.f32 %v4455_v18, %v1774_v48  ;;  %v1902_v27 = vpop.permute.xlu0 %1901 }
 0x29f   : > { %v1951_v63 = vmul.f32 %v1935_v33, %v1902_v27 }
 0x2a0   : > { %v1839_v38 = vadd.f32 %v1823_v49, %v4371_v40 }
 0x2a2   : > { %v4521_v34 = vadd.f32 %v1951_v63, %v1839_v38  ;;  %v1846_v11 = vpop.permute.xlu1 %1845 }
 0x2a3   : > { %v1937_v14 = vmul.f32 %v4468_v55, %v1846_v11  ;;  %v1974_v62 = vpop.permute.xlu0 %1973  ;;  %v4535_v55 = vcombine.high %v4378_v51, %v4378_v51  ;;  %v4943_v51 = vld [vmem:[#allocation52_spill] sm:$0xff] }
 0x2a4   : > { %v2065_v29 = vmul.f32 %v2035_v30, %v1974_v62  ;;  %v4548_v53 = vrot.slane %v4943_v51, %v3775_v16 }
 0x2a5   : > { %v1953_v18 = vadd.f32 %v1937_v14, %v4386_v21  ;;  %v4540_v21 = vrot.slane %v4535_v55, %v3775_v16 }
 0x2a6   : > { %v1850_v17 = vpop.permute.xlu1 %1849 }
 0x2a7   : > { %v4529_v0 = vadd.f32 %v2065_v29, %v1953_v18  ;;  %v1938_v40 = vmul.f32 %v1911_v20, %v1850_v17  ;;  %v1986_v25 = vpop.permute.xlu0 %1985 }
 0x2a8   : > { %v2068_v19 = vmul.f32 %v4526_v50, %v1986_v25 }
 0x2a9   : > { %v1954_v43 = vadd.f32 %v1938_v40, %v4478_v60 }
 0x2aa   : > { %v1858_v8 = vpop.permute.xlu1 %1857 }
 0x2ab   : > { %v1940_v32 = vmul.f32 %v1915_v15, %v1858_v8  ;;  %v1994_v23 = vpop.permute.xlu0 %1993  ;;  %v536_v8 = vcombine.high %v4449_v42, %v4449_v42 }
 0x2ac   : > { %v2070_v60 = vmul.f32 %v4540_v21, %v1994_v23 }
 0x2ad   : > { %v1956_v26 = vadd.f32 %v1940_v32, %v4400_v10  ;;  %v4552_v10 = vcombine.high %v4406_v52, %v4406_v52 }
 0x2ae   : > { %v1866_v57 = vpop.permute.xlu1 %1865 }
 0x2af   : > { %v1942_v20 = vmul.f32 %v1919_v36, %v1866_v57  ;;  %v2002_v44 = vpop.permute.xlu0 %2001  ;;  %v4542_v2 = vadd.f32 %v2068_v19, %v1956_v26  ;;  %v4580_v19 = vrot.slane %v4943_v51, %v3780_v28  ;;  %v2039_v26 = vrot.slane %v536_v8, %v3775_v16 }
 0x2b0   : > { %v2072_v36 = vmul.f32 %v4548_v53, %v2002_v44  ;;  %v4589_v57 = vrot.slane %v536_v8, %v3780_v28 }
 0x2b1   : > { %v1958_v31 = vadd.f32 %v1942_v20, %v4414_v5  ;;  %v2055_v5 = vrot.slane %v4552_v10, %v3775_v16 }
 0x2b2   : > { %v1874_v15 = vpop.permute.xlu1 %1873 }
 0x2b3   : > { %v1944_v24 = vmul.f32 %v1923_v7, %v1874_v15  ;;  %v2010_v46 = vpop.permute.xlu0 %2009  ;;  %v4554_v59 = vadd.f32 %v2070_v60, %v1958_v31  ;;  %v4563_v7 = vcombine.high %v4435_v12, %v4435_v12 }
 0x2b4   : > { %v2074_v38 = vmul.f32 %v2055_v5, %v2010_v46 }
 0x2b5   : > { %v1960_v35 = vadd.f32 %v1944_v24, %v4430_v47  ;;  %v4569_v18 = vrot.slane %v4563_v7, %v3775_v16 }
 0x2b6   : > { %v1882_v48 = vpop.permute.xlu1 %1881 }
 0x2b7   : > { %v1946_v49 = vmul.f32 %v1927_v54, %v1882_v48  ;;  %v2026_v27 = vpop.permute.xlu0 %2025  ;;  %v2088_v63 = vadd.f32 %v2072_v36, %v1960_v35 }
 0x2b8   : > { %v2078_v12 = vmul.f32 %v4569_v18, %v2026_v27 }
 0x2b9   : > { %v1962_v52 = vadd.f32 %v1946_v49, %v4444_v4 }
 0x2ba   : > { %v1890_v11 = vpop.permute.xlu1 %1889 }
 0x2bb   : > { %v1948_v14 = vmul.f32 %v1931_v61, %v1890_v11  ;;  %v2014_v62 = vpop.permute.xlu0 %2013  ;;  %v4565_v29 = vadd.f32 %v2074_v38, %v1962_v52 }
 0x2bc   : > { %v2075_v47 = vmul.f32 %v2055_v5, %v2014_v62 }
 0x2bd   : > { %v4572_v54 = vadd.f32 %v1948_v14, %v4458_v9 }
 0x2be   : > { %v4574_v17 = vadd.f32 %v2075_v47, %v1963_v39  ;;  %v1898_v4 = vpop.permute.xlu1 %1897 }
 0x2bf   : > { %v1950_v40 = vmul.f32 %v1935_v33, %v1898_v4 }
 0x2c0   : > { %v2106_v25 = vpop.permute.xlu0 %2105 }
 0x2c1   : > { %v1966_v61 = vadd.f32 %v1950_v40, %v4470_v58  ;;  %v2194_v15 = vmul.f32 %v4589_v57, %v2106_v25 }
 0x2c3   : > { %v1970_v32 = vpop.permute.xlu1 %1969  ;;  %v4584_v23 = vadd.f32 %v2078_v12, %v1966_v61 }
 0x2c4   : > { %v2064_v9 = vmul.f32 %v2035_v30, %v1970_v32  ;;  %v2130_v39 = vpop.permute.xlu0 %2129  ;;  %v2163_v30 = vrot.slane %v4941_v3, %v3780_v28  ;;  %v2175_v32 = vrot.slane %v4535_v55, %v3780_v28 }
 0x2c5   : > { %v2200_v33 = vmul.f32 %v4580_v19, %v2130_v39 }
 0x2c6   : > { %v4592_v58 = vadd.f32 %v2064_v9, %v4480_v41 }
 0x2c7   : > { %v2216_v20 = vadd.f32 %v2200_v33, %v2088_v63  ;;  %v1978_v44 = vpop.permute.xlu1 %1977 }
 0x2c8   : > { %v2066_v60 = vmul.f32 %v2039_v26, %v1978_v44  ;;  %v2146_v42 = vpop.permute.xlu0 %2145 }
 0x2c9   : > { %v2336_v31 = vcombine.high %v2216_v20, %v2216_v20  ;;  %v2343_v51 = vrot.slane %v2216_v20, %v3552_v22 }
 0x2ca   : > { %v2082_v24 = vadd.f32 %v2066_v60, %v1954_v43 }
 0x2cb   : > { %v2350_v46 = vrot.slane %v2336_v31, %v3552_v22  ;;  %v2351_v36 = vcombine.high %v2343_v51, %v2343_v51  ;;  %v1982_v35 = vpop.permute.xlu1 %1981 }
 0x2cc   : > { %v2210_v41 = vadd.f32 %v2194_v15, %v2082_v24  ;;  %v2067_v5 = vmul.f32 %v2039_v26, %v1982_v35  ;;  %v2102_v48 = vpop.permute.xlu0 %2101 }
 0x2cd   : > { %v2352_v49 = vcombine.high %v2350_v46, %v2350_v46  ;;  %v2517_v27 = vcombine.low %v2343_v51, %v2351_v36  ;;  %v2193_v63 = vmul.f32 %v2163_v30, %v2102_v48 }
 0x2ce   : > { %v2264_v38 = vcombine.high %v2210_v41, %v2210_v41  ;;  %v2271_v52 = vrot.slane %v2210_v41, %v3552_v22  ;;  %v4602_v11 = vadd.f32 %v2067_v5, %v4486_v37  ;;  %v2183_v37 = vrot.slane %v4552_v10, %v3780_v28 }
 0x2cf   : > { %v2518_v3 = vcombine.low %v2350_v46, %v2352_v49  ;;  %v2209_v43 = vadd.f32 %v2193_v63, %v4529_v0  ;;  %v1990_v14 = vpop.permute.xlu1 %1989  ;;  %v2525_v25 = vrot.slane %v2517_v27, %v3552_v22 }
 0x2d0   : > { %v4606_v62 = vrot.slane %v2264_v38, %v3552_v22  ;;  %v2279_v47 = vcombine.high %v2271_v52, %v2271_v52  ;;  %v2069_v4 = vmul.f32 %v4526_v50, %v1990_v14  ;;  %v2126_v40 = vpop.permute.xlu0 %2125 }
 0x2d1   : > { %v2532_v12 = vrot.slane %v2518_v3, %v3552_v22  ;;  %v2263_v61 = vrot.slane %v2209_v43, %v3552_v22  ;;  %v2199_v44 = vmul.f32 %v2175_v32, %v2126_v40 }
 0x2d2   : > { %v2450_v8 = vcombine.low %v2279_v47, %v4606_v62  ;;  %v4616_v0 = vadd.f32 %v2069_v4, %v4493_v1 }
 0x2d3   : > { %v2533_v9 = vcombine.low %v2525_v25, %v2532_v12  ;;  %v2449_v50 = vcombine.low %v2263_v61, %v2271_v52  ;;  %v1998_v39 = vpop.permute.xlu1 %1997 }
 0x2d4   : > { %v2464_v26 = vrot.slane %v2450_v8, %v3552_v22  ;;  %v2071_v33 = vmul.f32 %v4540_v21, %v1998_v39  ;;  %v2142_v20 = vpop.permute.xlu0 %2141  ;;  %v4944_v21 = vld [vmem:[#allocation48_spill] sm:$0xff] }
 0x2d5   : > { %2617 = vst [vmem:[%s4622_s20 + $0x28] sm:$0xff] %v2533_v9  ;;  %v2457_v10 = vrot.slane %v2449_v50, %v3552_v22  ;;  %v2203_v1 = vmul.f32 %v2183_v37, %v2142_v20  ;;  %v2059_v46 = vrot.slane %v4944_v21, %v3775_v16  ;;  %v4634_v36 = vrot.slane %v4944_v21, %v3780_v28 }
 0x2d6   : > { %v2087_v60 = vadd.f32 %v2071_v33, %v4499_v13  ;;  %v4645_v16 = vrot.slane %v4942_v56, %v3780_v28 }
 0x2d7   : > { %v2465_v55 = vcombine.low %v2457_v10, %v2464_v26  ;;  %v2219_v31 = vadd.f32 %v2203_v1, %v4574_v17  ;;  %v2006_v51 = vpop.permute.xlu1 %2005  ;;  %v2204_v5 = vmul.f32 %v4634_v36, %v2146_v42 }
 0x2d8   : > { %v2215_v15 = vadd.f32 %v2199_v44, %v2087_v60  ;;  %v2073_v24 = vmul.f32 %v4548_v53, %v2006_v51 }
 0x2d9   : > { %2613 = vst [vmem:[%s4622_s20 + $0x8] sm:$0xff] %v2465_v55 }
 0x2da   : > { %v4637_v35 = vadd.f32 %v2073_v24, %v4505_v45  ;;  %v2335_v10 = vrot.slane %v2215_v15, %v3552_v22 }
 0x2db   : > { %v2018_v41 = vpop.permute.xlu1 %2017 }
 0x2dc   : > { %v2076_v13 = vmul.f32 %v2059_v46, %v2018_v41 }
 0x2de   : > { %v2092_v17 = vadd.f32 %v2076_v13, %v4572_v54 }
 0x2e0   : > { %v4641_v48 = vadd.f32 %v2204_v5, %v2092_v17  ;;  %v2098_v53 = vpop.permute.xlu1 %2097 }
 0x2e1   : > { %v2192_v49 = vmul.f32 %v2163_v30, %v2098_v53  ;;  %v2158_v53 = vpop.permute.xlu0 %2157 }
 0x2e2   : > { %v2391_v40 = vrot.slane %v4641_v48, %v3552_v22 }
 0x2e3   : > { %v2208_v27 = vadd.f32 %v2192_v49, %v4592_v58 }
 0x2e4   : > { %v2114_v63 = vpop.permute.xlu1 %2113  ;;  %v2399_v33 = vcombine.high %v2391_v40, %v2391_v40 }
 0x2e5   : > { %v2240_v38 = vcombine.high %v2208_v27, %v2208_v27  ;;  %v2247_v45 = vrot.slane %v2208_v27, %v3552_v22  ;;  %v2196_v52 = vmul.f32 %v4645_v16, %v2114_v63 }
 0x2e6   : > { %v2552_v55 = vcombine.low %v2391_v40, %v2399_v33 }
 0x2e7   : > { %v2254_v42 = vrot.slane %v2240_v38, %v3552_v22  ;;  %v2255_v3 = vcombine.high %v2247_v45, %v2247_v45  ;;  %v2212_v54 = vadd.f32 %v2196_v52, %v4542_v2 }
 0x2e8   : > { %v2122_v43 = vpop.permute.xlu1 %2121  ;;  %v2566_v49 = vrot.slane %v2552_v55, %v3552_v22 }
 0x2e9   : > { %v2256_v14 = vcombine.high %v2254_v42, %v2254_v42  ;;  %v2432_v30 = vcombine.low %v2247_v45, %v2255_v3  ;;  %v2198_v47 = vmul.f32 %v2175_v32, %v2122_v43  ;;  %v2191_v32 = vrot.slane %v4563_v7, %v3780_v28 }
 0x2ea   : > { %v2288_v38 = vcombine.high %v2212_v54, %v2212_v54  ;;  %v2295_v45 = vrot.slane %v2212_v54, %v3552_v22 }
 0x2eb   : > { %v2433_v4 = vcombine.low %v2254_v42, %v2256_v14  ;;  %v2214_v56 = vadd.f32 %v2198_v47, %v4554_v59  ;;  %v2440_v25 = vrot.slane %v2432_v30, %v3552_v22  ;;  %v2207_v42 = vmul.f32 %v2191_v32, %v2158_v53 }
 0x2ec   : > { %v2138_v58 = vpop.permute.xlu1 %2137  ;;  %v2302_v14 = vrot.slane %v2288_v38, %v3552_v22  ;;  %v2303_v30 = vcombine.high %v2295_v45, %v2295_v45 }
 0x2ed   : > { %v2447_v12 = vrot.slane %v2433_v4, %v3552_v22  ;;  %v2202_v61 = vmul.f32 %v2183_v37, %v2138_v58  ;;  %v2312_v8 = vcombine.high %v2214_v56, %v2214_v56  ;;  %v4658_v2 = vrot.slane %v2214_v56, %v3552_v22 }
 0x2ef   : > { %v2448_v9 = vcombine.low %v2440_v25, %v2447_v12  ;;  %v2218_v50 = vadd.f32 %v2202_v61, %v4565_v29  ;;  %v2326_v59 = vrot.slane %v2312_v8, %v3552_v22  ;;  %v2327_v39 = vcombine.high %v4658_v2, %v4658_v2 }
 0x2f0   : > { %v2154_v26 = vpop.permute.xlu1 %2153  ;;  %v2383_v29 = vrot.slane %v2219_v31, %v3552_v22  ;;  %v2384_v25 = vcombine.high %v4641_v48, %v4641_v48  ;;  %v2304_v12 = vcombine.high %v2302_v14, %v2302_v14  ;;  %v2467_v61 = vcombine.low %v2295_v45, %v2303_v30 }
 0x2f1   : > { %2612 = vst [vmem:[%s4622_s20] sm:$0xff] %v2448_v9  ;;  %v2360_v20 = vcombine.high %v2218_v50, %v2218_v50  ;;  %v2206_v37 = vmul.f32 %v2191_v32, %v2154_v26  ;;  %v2328_v1 = vcombine.high %v2326_v59, %v2326_v59  ;;  %v2500_v44 = vcombine.low %v2327_v39, %v2326_v59 }
 0x2f2   : > { %v2367_v32 = vrot.slane %v2218_v50, %v3552_v22  ;;  %v2280_v9 = vcombine.high %v4606_v62, %v4606_v62  ;;  %v2398_v33 = vrot.slane %v2384_v25, %v3552_v22  ;;  %v2483_v50 = vcombine.low %v2302_v14, %v2304_v12 }
 0x2f3   : > { %v4669_v60 = vrot.slane %v2360_v20, %v3552_v22  ;;  %v2222_v28 = vadd.f32 %v2206_v37, %v4584_v23  ;;  %v2501_v7 = vcombine.low %v2328_v1, %v2335_v10  ;;  %v2508_v21 = vrot.slane %v2500_v44, %v3552_v22 }
 0x2f4   : > { %v2481_v20 = vrot.slane %v2467_v61, %v3552_v22  ;;  %v2375_v10 = vcombine.high %v2367_v32, %v2367_v32  ;;  %v2491_v55 = vrot.slane %v2483_v50, %v3552_v22 }
 0x2f5   : > { %v2376_v51 = vcombine.high %v4669_v60, %v4669_v60  ;;  %v2022_v24 = vpop.permute.xlu1 %2021  ;;  %v2515_v15 = vrot.slane %v2501_v7, %v3552_v22  ;;  %v2408_v17 = vcombine.high %v2222_v28, %v2222_v28  ;;  %v4678_v23 = vrot.slane %v2222_v28, %v3552_v22 }
 0x2f6   : > { %v2077_v41 = vmul.f32 %v2059_v46, %v2022_v24  ;;  %v2535_v24 = vcombine.low %v2375_v10, %v4669_v60 }
 0x2f7   : > { %v2551_v13 = vcombine.low %v2376_v51, %v2383_v29  ;;  %v2516_v5 = vcombine.low %v2508_v21, %v2515_v15  ;;  %v2422_v3 = vrot.slane %v2408_v17, %v3552_v22  ;;  %v2423_v43 = vcombine.high %v4678_v23, %v4678_v23 }
 0x2f8   : > { %v2093_v31 = vadd.f32 %v2077_v41, %v4515_v6  ;;  %v2400_v29 = vcombine.high %v2398_v33, %v2398_v33 }
 0x2f9   : > { %v2559_v27 = vrot.slane %v2551_v13, %v3552_v22  ;;  %v2030_v63 = vpop.permute.xlu1 %2029  ;;  %2616 = vst [vmem:[%s4622_s20 + $0x20] sm:$0xff] %v2516_v5  ;;  %v2424_v56 = vcombine.high %v2422_v3, %v2422_v3  ;;  %v2585_v58 = vcombine.low %v2423_v43, %v2422_v3  ;;  %v2549_v5 = vrot.slane %v2535_v24, %v3552_v22 }
 0x2fa   : > { %v2079_v46 = vmul.f32 %v4569_v18, %v2030_v63 }
 0x2fb   : > { %v2567_v52 = vcombine.low %v2559_v27, %v2566_v49  ;;  %v2593_v39 = vrot.slane %v2585_v58, %v3552_v22 }
 0x2fc   : > { %v2095_v6 = vadd.f32 %v2079_v46, %v4521_v34 }
 0x2fd   : > { %2619 = vst [vmem:[%s4622_s20 + $0x38] sm:$0xff] %v2567_v52 }
 0x2fe   : > { %v2223_v47 = vadd.f32 %v2207_v42, %v2095_v6  ;;  %v2110_v4 = vpop.permute.xlu1 %2109 }
 0x2ff   : > { %v2195_v54 = vmul.f32 %v4589_v57, %v2110_v4 }
 0x300   : > { %v2431_v18 = vrot.slane %v2223_v47, %v3552_v22 }
 0x301   : > { %v2211_v40 = vadd.f32 %v2195_v54, %v4602_v11 }
 0x302   : > { %v2586_v34 = vcombine.low %v2424_v56, %v2431_v18  ;;  %v2118_v8 = vpop.permute.xlu1 %2117 }
 0x303   : > { %v2287_v57 = vrot.slane %v2211_v40, %v3552_v22  ;;  %v2197_v59 = vmul.f32 %v4645_v16, %v2118_v8 }
 0x304   : > { %v2600_v11 = vrot.slane %v2586_v34, %v3552_v22 }
 0x305   : > { %v2466_v26 = vcombine.low %v2280_v9, %v2287_v57  ;;  %v2213_v48 = vadd.f32 %v2197_v59, %v4616_v0 }
 0x306   : > { %v2601_v37 = vcombine.low %v2593_v39, %v2600_v11  ;;  %v2134_v62 = vpop.permute.xlu1 %2133 }
 0x307   : > { %v2474_v1 = vrot.slane %v2466_v26, %v3552_v22  ;;  %v2311_v16 = vrot.slane %v2213_v48, %v3552_v22  ;;  %v2201_v44 = vmul.f32 %v4580_v19, %v2134_v62 }
 0x308   : > { %2621 = vst [vmem:[%s4622_s20 + $0x48] sm:$0xff] %v2601_v37 }
 0x309   : > { %v2482_v28 = vcombine.low %v2474_v1, %v2481_v20  ;;  %v2484_v0 = vcombine.low %v2311_v16, %v4658_v2  ;;  %v2217_v7 = vadd.f32 %v2201_v44, %v4637_v35  ;;  %v2568_v35 = vcombine.low %v2398_v33, %v2400_v29 }
 0x30a   : > { %v2150_v51 = vpop.permute.xlu1 %2149 }
 0x30b   : > { %2614 = vst [vmem:[%s4622_s20 + $0x10] sm:$0xff] %v2482_v28  ;;  %v2498_v21 = vrot.slane %v2484_v0, %v3552_v22  ;;  %v2359_v19 = vrot.slane %v2217_v7, %v3552_v22  ;;  %v2205_v15 = vmul.f32 %v4634_v36, %v2150_v51  ;;  %v2576_v36 = vrot.slane %v2568_v35, %v3552_v22 }
 0x30d   : > { %v2499_v41 = vcombine.low %v2491_v55, %v2498_v21  ;;  %v2534_v2 = vcombine.low %v2359_v19, %v2367_v32  ;;  %v2221_v13 = vadd.f32 %v2205_v15, %v2093_v31 }
 0x30f   : > { %2615 = vst [vmem:[%s4622_s20 + $0x18] sm:$0xff] %v2499_v41  ;;  %v2542_v60 = vrot.slane %v2534_v2, %v3552_v22  ;;  %v2407_v17 = vrot.slane %v2221_v13, %v3552_v22 }
 0x311   : > { %v2550_v53 = vcombine.low %v2542_v60, %v2549_v5  ;;  %v2569_v49 = vcombine.low %v2407_v17, %v4678_v23 }
 0x313   : > { %2618 = vst [vmem:[%s4622_s20 + $0x30] sm:$0xff] %v2550_v53  ;;  %v2583_v31 = vrot.slane %v2569_v49, %v3552_v22 }
 0x315   : > { %v2584_v27 = vcombine.low %v2576_v36, %v2583_v31 }
 0x317   : > { %2620 = vst [vmem:[%s4622_s20 + $0x40] sm:$0xff] %v2584_v27 }
 0x318   : > { %3148 = shalt.err (!%p3145_p7)
}
 0x319   : > { %s3149_s14 = scalar_lea.hbm %s4732_s23, 1280  ;;  %s3153_s7 = scalar_lea.hbm %s4783_s4, 2560 }
 0x31a   : > { %p3150_p1 = scmp.ne.s32.totalorder %s4732_s23, %s3149_s14  ;;  %p3154_p0 = scmp.lt.u32.totalorder %s4732_s23, %s4783_s4 }
 0x31b   : > { %p3155_p9 = scmp.lt.u32.totalorder %s3153_s7, %s3149_s14  ;;  %p3157_p2 = scmp.lt.u32.totalorder %s3149_s14, %s4732_s23 }
 0x31c   : > { %p3151_p8 = pnand %p3150_p1, %p4945_p13 }
 0x31d   : > { %p3156_p12 = por %p3155_p9, %p3154_p0 }
 0x31e   : > { %p3152_p11 = pneg %p3151_p8 }
 0x31f   : > { %p3158_p6 = por %p3157_p2, %p3156_p12 }
 0x321   : > { %p3159_p10 = pnand %p3158_p6, %p3152_p11 }
 0x323   : > { %3162 = shalt.err (!%p3159_p10)
}
 0x324   : > { %s3246_s26 = smov 128   ;;  %s3247_s11 = smov 8  }
 0x325   : > { %2897 = dma.vmem_to_hbm [thread:$0]  (%p4945_p13), %s4734_s28, 1280, %s4732_s23, %s2623_s19, %s3246_s26, %s3246_s26, %s3247_s11  }
 0x326 PF: > { %s2651_s20 = sand.u32 1, %s3201_s15   ;;  %p4946_p4 = scmp.ne.s32.totalorder %s4832_s22, 0 }
 0x327   : > { %p4947_p5 = scmp.ge.s32.totalorder %s3213_s18, 2  ;;  %s2652_s27 = scalar_lea.sflag [#allocation5], %s2651_s20 }
 0x329   : > { %p2914_p3 = pnand %p4947_p5, %p4946_p4 }
 0x32b   : > { %3196 = dma.done.wait (!%p2914_p3), %s2652_s27, 1280  }
 0x32c   : > { %3198 = vsyncadd (!%p2914_p3), %s2652_s27, 4294966016  ;;  %p21_p7 = scmp.ge.s32.totalorder %s3384_s10, 4   ;;  %s4948_s15 = smov %s3205_s16 }
 0x32d   : > { %s4949_s16 = smov %s3209_s17  ;;  %s4950_s17 = smov %s3400_s13 }
 0x32e   : > { %s4951_s18 = smov %s3384_s10  ;;  %23 = sbr.rel (!%p21_p7) target bundleno = 11 (0xb), region = 102 }
 0x335   :  { %2657 = vsyncpa [#allocation4], 1 }
 0x336   :  { %2659 = vsyncpa [#allocation4 + $0x1], 1 }
 0x337   :  { %2660 = vsyncpa [#allocation7], 1 }
 0x338   :  { %2662 = vsyncpa [#allocation7 + $0x1], 1 }
 0x339   :  { %2663 = vsyncpa [#allocation10], 1 }
 0x33a   :  { %2664 = vsyncpa [#allocation5], 1 }
 0x33b   :  { %2666 = vsyncpa [#allocation5 + $0x1], 1 }

</bundles_post_ra>
